<compile_context>
chip_gen: v6e
topology: v6e:2x2x1
jax: 0.10.0
libtpu: 0.0.40
codegen_flags: <defaults>
</compile_context>

<pallas_src>
import jax
import jax.numpy as jnp
from jax import lax
from jax.experimental import pallas as pl
from jax.experimental.pallas import tpu as pltpu

NUM_CLASSES = 5
PADDED_CLASSES = 128      # lane-dense fc output; real logits live in [:, :5]


def _seq_tile_and_vmem():
    """Per-generation seq tile cap and VMEM limit (safe fallbacks)."""
    ts_max, vmem_limit = 1024, 48 * 1024 * 1024       # v7x: 64 MiB VMEM / TC
    try:
        cap = pltpu.get_tpu_info().vmem_capacity_bytes
        if cap >= 100 * 1024 * 1024:                   # v5e / v6e: 128 MiB VMEM
            ts_max, vmem_limit = 2048, 96 * 1024 * 1024
    except Exception:
        pass
    return ts_max, vmem_limit


def custom_model_forward(all_hidden_states, params):
    """CustomModel.forward (labels=None): softmax(fc([head(cat4) | cls4])).

    all_hidden_states : (L, B, S, H) stacked backbone hidden states, L >= 4
    returns           : (B, 5) float32 softmax probabilities
    """
    ww4, wb, vw, vb, fcw_pad, fcb_pad = params
    L, B, S, H = all_hidden_states.shape
    assert L >= 4
    F4, F8 = 4 * H, 8 * H
    x_dtype = all_hidden_states.dtype
    ww4 = ww4.astype(x_dtype)     # MXU inputs in the hidden-state dtype (bf16)
    vw = vw.astype(x_dtype)

    ts_max, vmem_limit = _seq_tile_and_vmem()
    ts = S if S <= ts_max else ts_max
    n_seq = pl.cdiv(S, ts)
    s_valid = S
    needs_mask = (S % ts) != 0

    if needs_mask:
        # Rare ragged path: zero-pad the last-4-layer slice along seq so the
        # MXU contraction never touches undefined rows of the edge block; the
        # in-kernel score mask keeps padded rows out of the softmax.
        x = all_hidden_states[L - 4:L]
        pad = n_seq * ts - S
        x = jnp.pad(x, ((0, 0), (0, 0), (0, pad), (0, 0)))
        layer_ids = (3, 2, 1, 0)                 # [-1, -2, -3, -4] after slice
    else:
        # Common path: no HBM concat / copy — BlockSpecs index layers directly.
        x = all_hidden_states
        layer_ids = (L - 1, L - 2, L - 3, L - 4)

    def kernel(x0_ref, x1_ref, x2_ref, x3_ref,
               ww_ref, wb_ref, vw_ref, vb_ref, fcw_ref, fcb_ref,
               out_ref, m_ref, l_ref, ctx_ref, cls_ref):
        s_idx = pl.program_id(1)
        last = pl.num_programs(1) - 1
        x_refs = (x0_ref, x1_ref, x2_ref, x3_ref)

        @pl.when(s_idx == 0)
        def _init():
            m_ref[...] = jnp.full_like(m_ref, -1e30)
            l_ref[...] = jnp.zeros_like(l_ref)
            ctx_ref[...] = jnp.zeros_like(ctx_ref)
            # cls_pooling = cat_over_last_layers[:, 0] (seq row 0 is in tile 0).
            for li in range(4):
                cls_ref[:, li * H:(li + 1) * H] = (
                    x_refs[li][0:1, :].astype(jnp.float32))

        # att = tanh(W(features)), W split over the 4 concatenated layer chunks.
        # Flat unrolled MXU accumulate chain (no intervening VPU ops).
        xs = tuple(r[...] for r in x_refs)                       # (ts, H) bf16
        acc = jnp.dot(xs[0], ww_ref[0], preferred_element_type=jnp.float32)
        acc = acc + jnp.dot(xs[1], ww_ref[1], preferred_element_type=jnp.float32)
        acc = acc + jnp.dot(xs[2], ww_ref[2], preferred_element_type=jnp.float32)
        acc = acc + jnp.dot(xs[3], ww_ref[3], preferred_element_type=jnp.float32)
        att = jnp.tanh(acc + wb_ref[...]).astype(x_dtype)        # (ts, H) bf16

        # score = V(att): bf16 x bf16 MXU matmul (f32 accumulate).
        score = (jnp.dot(att, vw_ref[...], preferred_element_type=jnp.float32)
                 + vb_ref[...])                                  # (ts, 1) f32
        if needs_mask:   # statically dead for S % ts == 0
            row = s_idx * ts + lax.broadcasted_iota(jnp.int32, (ts, 1), 0)
            score = jnp.where(row < s_valid, score, -1e30)

        # Online softmax over the sequence; at most one (ts,1) value live.
        m_prev = m_ref[...]                                      # (1, 1)
        m_new = jnp.maximum(m_prev, jnp.max(score, axis=0, keepdims=True))
        alpha = jnp.exp(m_prev - m_new)                          # (1, 1)
        p = jnp.exp(score - m_new)                               # (ts, 1); score dead
        l_ref[...] = alpha * l_ref[...] + jnp.sum(p, axis=0, keepdims=True)
        m_ref[...] = m_new
        p_b = p.astype(x_dtype)                                  # (ts, 1) bf16; p dead

        # context partial: p^T @ X on the MXU (contract over the seq dim).
        for li in range(4):
            contrib = lax.dot_general(
                p_b, xs[li], dimension_numbers=(((0,), (0,)), ((), ())),
                preferred_element_type=jnp.float32)              # (1, H) f32
            ctx_ref[:, li * H:(li + 1) * H] = (
                alpha * ctx_ref[:, li * H:(li + 1) * H] + contrib)

        @pl.when(s_idx == last)
        def _finalize():
            # feature = [context_vector | cls_pooling]; fused fc + softmax.
            inv_l = pl.reciprocal(l_ref[...], approx=False)      # (1, 1)
            ctx = ctx_ref[...] * inv_l                           # (1, 4H) f32
            logits = (jnp.dot(ctx, fcw_ref[0:F4, :],
                              preferred_element_type=jnp.float32)
                      + jnp.dot(cls_ref[...], fcw_ref[F4:F8, :],
                                preferred_element_type=jnp.float32)
                      + fcb_ref[...])                            # (1, 128) f32
            logits = logits - jnp.max(logits, axis=-1, keepdims=True)
            e = jnp.exp(logits)
            out_ref[...] = (
                e * pl.reciprocal(jnp.sum(e, axis=-1, keepdims=True),
                                  approx=False)).astype(out_ref.dtype)

    def layer_spec(layer_idx):
        # One (ts, H) tile of one layer, read straight from the stacked tensor.
        return pl.BlockSpec((None, None, ts, H),
                            lambda b, s, li=layer_idx: (li, b, s, 0))

    probs_pad = pl.pallas_call(
        kernel,
        out_shape=jax.ShapeDtypeStruct((B, 1, PADDED_CLASSES), jnp.float32),
        grid=(B, n_seq),
        in_specs=[
            layer_spec(layer_ids[0]), layer_spec(layer_ids[1]),
            layer_spec(layer_ids[2]), layer_spec(layer_ids[3]),
            # Constant block indices: weights are DMA'd to VMEM once.
            pl.BlockSpec((4, H, H), lambda b, s: (0, 0, 0)),        # W weight^T (split)
            pl.BlockSpec((1, H), lambda b, s: (0, 0)),              # W bias
            pl.BlockSpec((H, 1), lambda b, s: (0, 0)),              # V weight^T (bf16)
            pl.BlockSpec((1, 1), lambda b, s: (0, 0)),              # V bias
            pl.BlockSpec((F8, PADDED_CLASSES), lambda b, s: (0, 0)),  # fc weight^T (padded)
            pl.BlockSpec((1, PADDED_CLASSES), lambda b, s: (0, 0)),   # fc bias (padded)
        ],
        out_specs=pl.BlockSpec((None, 1, PADDED_CLASSES), lambda b, s: (b, 0, 0)),
        scratch_shapes=[
            pltpu.VMEM((1, 1), jnp.float32),     # running max  m
            pltpu.VMEM((1, 1), jnp.float32),     # running sum  l
            pltpu.VMEM((1, F4), jnp.float32),    # running context vector
            pltpu.VMEM((1, F4), jnp.float32),    # cls pooling (captured on tile 0)
        ],
        compiler_params=pltpu.CompilerParams(
            dimension_semantics=("parallel", "arbitrary"),
            vmem_limit_bytes=vmem_limit),
    )(x, x, x, x, ww4, wb, vw, vb, fcw_pad, fcb_pad)

    # TODO(synk): for B == 1 on v7x both TensorCores cannot be kept busy with a
    # batch-parallel grid; a seq-split + tiny combine step would be needed.
    return probs_pad.reshape(B, PADDED_CLASSES)[:, :NUM_CLASSES]


def init_params(key, hidden_size):
    """Deterministic parameter init mirroring the module's __init__ shapes."""
    h = hidden_size
    h8 = 8 * h
    k = jax.random.split(key, 5)
    initializer_range = 0.02  # typical self.config.initializer_range

    # AttentionHead(h_size=4H, hidden_dim=H): W: Linear(4H, H) transposed and
    # split into 4 (H, H) chunks; chunk l multiplies hidden_states[-(l+1)],
    # matching the torch.cat((h[-1], h[-2], h[-3], h[-4]), -1) order.
    ww4 = jax.random.normal(k[0], (4, h, h), jnp.float32) * 0.05
    wb = jax.random.normal(k[1], (1, h), jnp.float32) * 0.05
    vw = jax.random.normal(k[2], (h, 1), jnp.float32) * 0.05
    vb = jax.random.normal(k[3], (1, 1), jnp.float32) * 0.05

    # fc = Linear(8H, 5): weight ~ N(0, initializer_range), bias = 0.
    # Class dim padded to 128 lanes; padded logits get bias -1e30 so their
    # softmax probability underflows to exactly 0.
    fcw = (jax.random.normal(k[4], (h8, NUM_CLASSES), jnp.float32)
           * initializer_range)
    fcw_pad = jnp.zeros((h8, PADDED_CLASSES), jnp.float32)
    fcw_pad = fcw_pad.at[:, :NUM_CLASSES].set(fcw)
    fcb_pad = jnp.full((1, PADDED_CLASSES), -1e30, jnp.float32)
    fcb_pad = fcb_pad.at[:, :NUM_CLASSES].set(0.0)
    return ww4, wb, vw, vb, fcw_pad, fcb_pad


if __name__ == "__main__":
    # TODO(synk): the AutoModel transformer backbone is not re-implemented; its
    # stacked hidden states are synthesized (in bf16) as the kernel input.
    key = jax.random.PRNGKey(0)
    k_hs, k_param = jax.random.split(key)

    L, B, S, H = 5, 2, 8, 32          # layers, batch, seq, hidden (4H = 128)
    all_hidden_states = jax.random.normal(
        k_hs, (L, B, S, H), jnp.float32).astype(jnp.bfloat16)
    params = init_params(k_param, H)

    out = custom_model_forward(all_hidden_states, params)
    out = jax.block_until_ready(out)

    assert out.shape == (B, NUM_CLASSES)
    # rows of the softmax output must sum to 1
    assert bool(jnp.all(jnp.abs(jnp.sum(out, axis=-1) - 1.0) < 1e-4))
    print("KERNEL_OK")
</pallas_src>

<mosaic_0001>
module attributes {stable_mosaic.version = 11 : i64} {
  func.func @kernel(%arg0: i32, %arg1: i32, %arg2: memref<1x1x8x32xbf16, #tpu.memory_space<vmem>>, %arg3: memref<1x1x8x32xbf16, #tpu.memory_space<vmem>>, %arg4: memref<1x1x8x32xbf16, #tpu.memory_space<vmem>>, %arg5: memref<1x1x8x32xbf16, #tpu.memory_space<vmem>>, %arg6: memref<4x32x32xbf16, #tpu.memory_space<vmem>>, %arg7: memref<1x32xf32, #tpu.memory_space<vmem>>, %arg8: memref<32x1xbf16, #tpu.memory_space<vmem>>, %arg9: memref<1x1xf32, #tpu.memory_space<vmem>>, %arg10: memref<256x128xf32, #tpu.memory_space<vmem>>, %arg11: memref<1x128xf32, #tpu.memory_space<vmem>>, %arg12: memref<1x1x128xf32, #tpu.memory_space<vmem>>, %arg13: memref<1x1xf32, #tpu.memory_space<vmem>>, %arg14: memref<1x1xf32, #tpu.memory_space<vmem>>, %arg15: memref<1x128xf32, #tpu.memory_space<vmem>>, %arg16: memref<1x128xf32, #tpu.memory_space<vmem>>) attributes {dimension_semantics = [#tpu.dimension_semantics<parallel>, #tpu.dimension_semantics<arbitrary>], iteration_bounds = array<i64: 2, 1>, scalar_prefetch = 0 : i64, scratch_operands = 4 : i64, tpu.core_type = #tpu.core_type<tc>, window_params = [{transform_indices = @transform_0, window_bounds = array<i64: 1, 1, 8, 32>}, {transform_indices = @transform_1, window_bounds = array<i64: 1, 1, 8, 32>}, {transform_indices = @transform_2, window_bounds = array<i64: 1, 1, 8, 32>}, {transform_indices = @transform_3, window_bounds = array<i64: 1, 1, 8, 32>}, {pipeline_mode = #tpu.pipeline_mode<synchronous>, transform_indices = @transform_4, window_bounds = array<i64: 4, 32, 32>}, {pipeline_mode = #tpu.pipeline_mode<synchronous>, transform_indices = @transform_5, window_bounds = array<i64: 1, 32>}, {pipeline_mode = #tpu.pipeline_mode<synchronous>, transform_indices = @transform_6, window_bounds = array<i64: 32, 1>}, {pipeline_mode = #tpu.pipeline_mode<synchronous>, transform_indices = @transform_7, window_bounds = array<i64: 1, 1>}, {pipeline_mode = #tpu.pipeline_mode<synchronous>, transform_indices = @transform_8, window_bounds = array<i64: 256, 128>}, {pipeline_mode = #tpu.pipeline_mode<synchronous>, transform_indices = @transform_9, window_bounds = array<i64: 1, 128>}, {transform_indices = @transform_10, window_bounds = array<i64: 1, 1, 128>}]} {
    %c0_i32 = arith.constant 0 : i32
    %0 = arith.cmpi eq, %arg1, %c0_i32 : i32
    %1 = arith.extui %0 : i1 to i32
    %c0_i32_0 = arith.constant 0 : i32
    %2 = arith.cmpi ne, %1, %c0_i32_0 : i32
    scf.if %2 {
      %cst_64 = arith.constant -1.000000e+30 : f32
      %80 = vector.broadcast %cst_64 : f32 to vector<1x1xf32>
      %c0_65 = arith.constant 0 : index
      %c0_66 = arith.constant 0 : index
      %81 = vector.load %arg13[%c0_65, %c0_66] : memref<1x1xf32, #tpu.memory_space<vmem>>, vector<1x1xf32>
      tpu.vector_store %arg13[%c0_65, %c0_66], %80 {strides = array<i32>} : memref<1x1xf32, #tpu.memory_space<vmem>>, vector<1x1xf32>,
      %cst_67 = arith.constant 0.000000e+00 : f32
      %82 = vector.broadcast %cst_67 : f32 to vector<1x1xf32>
      %c0_68 = arith.constant 0 : index
      %c0_69 = arith.constant 0 : index
      %83 = vector.load %arg14[%c0_68, %c0_69] : memref<1x1xf32, #tpu.memory_space<vmem>>, vector<1x1xf32>
      tpu.vector_store %arg14[%c0_68, %c0_69], %82 {strides = array<i32>} : memref<1x1xf32, #tpu.memory_space<vmem>>, vector<1x1xf32>,
      %cst_70 = arith.constant 0.000000e+00 : f32
      %84 = vector.broadcast %cst_70 : f32 to vector<1x128xf32>
      %c0_71 = arith.constant 0 : index
      %c0_72 = arith.constant 0 : index
      %85 = vector.load %arg15[%c0_71, %c0_72] : memref<1x128xf32, #tpu.memory_space<vmem>>, vector<1x128xf32>
      tpu.vector_store %arg15[%c0_71, %c0_72], %84 {strides = array<i32>} : memref<1x128xf32, #tpu.memory_space<vmem>>, vector<1x128xf32>,
      %c0_73 = arith.constant 0 : index
      %c0_74 = arith.constant 0 : index
      %c0_75 = arith.constant 0 : index
      %c0_76 = arith.constant 0 : index
      %86 = vector.load %arg2[%c0_73, %c0_74, %c0_75, %c0_76] : memref<1x1x8x32xbf16, #tpu.memory_space<vmem>>, vector<1x1x1x32xbf16>
      %87 = vector.shape_cast %86 : vector<1x1x1x32xbf16> to vector<1x32xbf16>
      %88 = arith.extf %87 : vector<1x32xbf16> to vector<1x32xf32>
      %c0_77 = arith.constant 0 : index
      %c0_78 = arith.constant 0 : index
      %89 = vector.load %arg16[%c0_77, %c0_78] : memref<1x128xf32, #tpu.memory_space<vmem>>, vector<1x32xf32>
      tpu.vector_store %arg16[%c0_77, %c0_78], %88 {strides = array<i32>} : memref<1x128xf32, #tpu.memory_space<vmem>>, vector<1x32xf32>,
      %c0_79 = arith.constant 0 : index
      %c0_80 = arith.constant 0 : index
      %c0_81 = arith.constant 0 : index
      %c0_82 = arith.constant 0 : index
      %90 = vector.load %arg3[%c0_79, %c0_80, %c0_81, %c0_82] : memref<1x1x8x32xbf16, #tpu.memory_space<vmem>>, vector<1x1x1x32xbf16>
      %91 = vector.shape_cast %90 : vector<1x1x1x32xbf16> to vector<1x32xbf16>
      %92 = arith.extf %91 : vector<1x32xbf16> to vector<1x32xf32>
      %c0_83 = arith.constant 0 : index
      %c32_84 = arith.constant 32 : index
      %93 = vector.load %arg16[%c0_83, %c32_84] : memref<1x128xf32, #tpu.memory_space<vmem>>, vector<1x32xf32>
      tpu.vector_store %arg16[%c0_83, %c32_84], %92 {strides = array<i32>} : memref<1x128xf32, #tpu.memory_space<vmem>>, vector<1x32xf32>,
      %c0_85 = arith.constant 0 : index
      %c0_86 = arith.constant 0 : index
      %c0_87 = arith.constant 0 : index
      %c0_88 = arith.constant 0 : index
      %94 = vector.load %arg4[%c0_85, %c0_86, %c0_87, %c0_88] : memref<1x1x8x32xbf16, #tpu.memory_space<vmem>>, vector<1x1x1x32xbf16>
      %95 = vector.shape_cast %94 : vector<1x1x1x32xbf16> to vector<1x32xbf16>
      %96 = arith.extf %95 : vector<1x32xbf16> to vector<1x32xf32>
      %c0_89 = arith.constant 0 : index
      %c64_90 = arith.constant 64 : index
      %97 = vector.load %arg16[%c0_89, %c64_90] : memref<1x128xf32, #tpu.memory_space<vmem>>, vector<1x32xf32>
      tpu.vector_store %arg16[%c0_89, %c64_90], %96 {strides = array<i32>} : memref<1x128xf32, #tpu.memory_space<vmem>>, vector<1x32xf32>,
      %c0_91 = arith.constant 0 : index
      %c0_92 = arith.constant 0 : index
      %c0_93 = arith.constant 0 : index
      %c0_94 = arith.constant 0 : index
      %98 = vector.load %arg5[%c0_91, %c0_92, %c0_93, %c0_94] : memref<1x1x8x32xbf16, #tpu.memory_space<vmem>>, vector<1x1x1x32xbf16>
      %99 = vector.shape_cast %98 : vector<1x1x1x32xbf16> to vector<1x32xbf16>
      %100 = arith.extf %99 : vector<1x32xbf16> to vector<1x32xf32>
      %c0_95 = arith.constant 0 : index
      %c96_96 = arith.constant 96 : index
      %101 = vector.load %arg16[%c0_95, %c96_96] : memref<1x128xf32, #tpu.memory_space<vmem>>, vector<1x32xf32>
      tpu.vector_store %arg16[%c0_95, %c96_96], %100 {strides = array<i32>} : memref<1x128xf32, #tpu.memory_space<vmem>>, vector<1x32xf32>,
    } else {
    }
    %c0 = arith.constant 0 : index
    %c0_1 = arith.constant 0 : index
    %c0_2 = arith.constant 0 : index
    %c0_3 = arith.constant 0 : index
    %3 = vector.load %arg2[%c0, %c0_1, %c0_2, %c0_3] : memref<1x1x8x32xbf16, #tpu.memory_space<vmem>>, vector<1x1x8x32xbf16>
    %4 = vector.shape_cast %3 : vector<1x1x8x32xbf16> to vector<8x32xbf16>
    %c0_4 = arith.constant 0 : index
    %c0_5 = arith.constant 0 : index
    %c0_6 = arith.constant 0 : index
    %c0_7 = arith.constant 0 : index
    %5 = vector.load %arg3[%c0_4, %c0_5, %c0_6, %c0_7] : memref<1x1x8x32xbf16, #tpu.memory_space<vmem>>, vector<1x1x8x32xbf16>
    %6 = vector.shape_cast %5 : vector<1x1x8x32xbf16> to vector<8x32xbf16>
    %c0_8 = arith.constant 0 : index
    %c0_9 = arith.constant 0 : index
    %c0_10 = arith.constant 0 : index
    %c0_11 = arith.constant 0 : index
    %7 = vector.load %arg4[%c0_8, %c0_9, %c0_10, %c0_11] : memref<1x1x8x32xbf16, #tpu.memory_space<vmem>>, vector<1x1x8x32xbf16>
    %8 = vector.shape_cast %7 : vector<1x1x8x32xbf16> to vector<8x32xbf16>
    %c0_12 = arith.constant 0 : index
    %c0_13 = arith.constant 0 : index
    %c0_14 = arith.constant 0 : index
    %c0_15 = arith.constant 0 : index
    %9 = vector.load %arg5[%c0_12, %c0_13, %c0_14, %c0_15] : memref<1x1x8x32xbf16, #tpu.memory_space<vmem>>, vector<1x1x8x32xbf16>
    %10 = vector.shape_cast %9 : vector<1x1x8x32xbf16> to vector<8x32xbf16>
    %c0_16 = arith.constant 0 : index
    %c0_17 = arith.constant 0 : index
    %c0_18 = arith.constant 0 : index
    %11 = vector.load %arg6[%c0_16, %c0_17, %c0_18] : memref<4x32x32xbf16, #tpu.memory_space<vmem>>, vector<1x32x32xbf16>
    %12 = vector.shape_cast %11 : vector<1x32x32xbf16> to vector<32x32xbf16>
    %cst = arith.constant dense<0.000000e+00> : vector<8x32xf32>
    %13 = tpu.matmul %4, %12, %cst {dimension_numbers = #tpu.dot_dimension_numbers<[1], [0], [0], [1], [0, 0, 1, 1], [], []>} : vector<8x32xbf16>, vector<32x32xbf16>, vector<8x32xf32> -> vector<8x32xf32>
    %c1 = arith.constant 1 : index
    %c0_19 = arith.constant 0 : index
    %c0_20 = arith.constant 0 : index
    %14 = vector.load %arg6[%c1, %c0_19, %c0_20] : memref<4x32x32xbf16, #tpu.memory_space<vmem>>, vector<1x32x32xbf16>
    %15 = vector.shape_cast %14 : vector<1x32x32xbf16> to vector<32x32xbf16>
    %cst_21 = arith.constant dense<0.000000e+00> : vector<8x32xf32>
    %16 = tpu.matmul %6, %15, %cst_21 {dimension_numbers = #tpu.dot_dimension_numbers<[1], [0], [0], [1], [0, 0, 1, 1], [], []>} : vector<8x32xbf16>, vector<32x32xbf16>, vector<8x32xf32> -> vector<8x32xf32>
    %17 = arith.addf %13, %16 : vector<8x32xf32>
    %c2 = arith.constant 2 : index
    %c0_22 = arith.constant 0 : index
    %c0_23 = arith.constant 0 : index
    %18 = vector.load %arg6[%c2, %c0_22, %c0_23] : memref<4x32x32xbf16, #tpu.memory_space<vmem>>, vector<1x32x32xbf16>
    %19 = vector.shape_cast %18 : vector<1x32x32xbf16> to vector<32x32xbf16>
    %cst_24 = arith.constant dense<0.000000e+00> : vector<8x32xf32>
    %20 = tpu.matmul %8, %19, %cst_24 {dimension_numbers = #tpu.dot_dimension_numbers<[1], [0], [0], [1], [0, 0, 1, 1], [], []>} : vector<8x32xbf16>, vector<32x32xbf16>, vector<8x32xf32> -> vector<8x32xf32>
    %21 = arith.addf %17, %20 : vector<8x32xf32>
    %c3 = arith.constant 3 : index
    %c0_25 = arith.constant 0 : index
    %c0_26 = arith.constant 0 : index
    %22 = vector.load %arg6[%c3, %c0_25, %c0_26] : memref<4x32x32xbf16, #tpu.memory_space<vmem>>, vector<1x32x32xbf16>
    %23 = vector.shape_cast %22 : vector<1x32x32xbf16> to vector<32x32xbf16>
    %cst_27 = arith.constant dense<0.000000e+00> : vector<8x32xf32>
    %24 = tpu.matmul %10, %23, %cst_27 {dimension_numbers = #tpu.dot_dimension_numbers<[1], [0], [0], [1], [0, 0, 1, 1], [], []>} : vector<8x32xbf16>, vector<32x32xbf16>, vector<8x32xf32> -> vector<8x32xf32>
    %25 = arith.addf %21, %24 : vector<8x32xf32>
    %c0_28 = arith.constant 0 : index
    %c0_29 = arith.constant 0 : index
    %26 = vector.load %arg7[%c0_28, %c0_29] : memref<1x32xf32, #tpu.memory_space<vmem>>, vector<1x32xf32>
    %27 = vector.broadcast %26 : vector<1x32xf32> to vector<8x32xf32>
    %28 = arith.addf %25, %27 : vector<8x32xf32>
    %29 = math.tanh %28 : vector<8x32xf32>
    %30 = arith.truncf %29 : vector<8x32xf32> to vector<8x32xbf16>
    %c0_30 = arith.constant 0 : index
    %c0_31 = arith.constant 0 : index
    %31 = vector.load %arg8[%c0_30, %c0_31] : memref<32x1xbf16, #tpu.memory_space<vmem>>, vector<32x1xbf16>
    %cst_32 = arith.constant dense<0.000000e+00> : vector<8x1xf32>
    %32 = tpu.matmul %30, %31, %cst_32 {dimension_numbers = #tpu.dot_dimension_numbers<[1], [0], [0], [1], [0, 0, 1, 1], [], []>} : vector<8x32xbf16>, vector<32x1xbf16>, vector<8x1xf32> -> vector<8x1xf32>
    %c0_33 = arith.constant 0 : index
    %c0_34 = arith.constant 0 : index
    %33 = vector.load %arg9[%c0_33, %c0_34] : memref<1x1xf32, #tpu.memory_space<vmem>>, vector<1x1xf32>
    %34 = vector.broadcast %33 : vector<1x1xf32> to vector<8x1xf32>
    %35 = arith.addf %32, %34 : vector<8x1xf32>
    %c0_35 = arith.constant 0 : index
    %c0_36 = arith.constant 0 : index
    %36 = vector.load %arg13[%c0_35, %c0_36] : memref<1x1xf32, #tpu.memory_space<vmem>>, vector<1x1xf32>
    %cst_37 = arith.constant dense<0xFF800000> : vector<1xf32>
    %37 = vector.multi_reduction <maximumf>, %35, %cst_37 [0] : vector<8x1xf32> to vector<1xf32>
    %38 = vector.shape_cast %37 : vector<1xf32> to vector<1x1xf32>
    %39 = arith.maximumf %36, %38 : vector<1x1xf32>
    %40 = arith.subf %36, %39 : vector<1x1xf32>
    %41 = math.exp %40 : vector<1x1xf32>
    %42 = vector.broadcast %39 : vector<1x1xf32> to vector<8x1xf32>
    %43 = arith.subf %35, %42 : vector<8x1xf32>
    %44 = math.exp %43 : vector<8x1xf32>
    %c0_38 = arith.constant 0 : index
    %c0_39 = arith.constant 0 : index
    %45 = vector.load %arg14[%c0_38, %c0_39] : memref<1x1xf32, #tpu.memory_space<vmem>>, vector<1x1xf32>
    %46 = arith.mulf %41, %45 : vector<1x1xf32>
    %cst_40 = arith.constant dense<0.000000e+00> : vector<1xf32>
    %47 = vector.multi_reduction <add>, %44, %cst_40 [0] : vector<8x1xf32> to vector<1xf32>
    %48 = vector.shape_cast %47 : vector<1xf32> to vector<1x1xf32>
    %49 = arith.addf %46, %48 : vector<1x1xf32>
    %c0_41 = arith.constant 0 : index
    %c0_42 = arith.constant 0 : index
    %50 = vector.load %arg14[%c0_41, %c0_42] : memref<1x1xf32, #tpu.memory_space<vmem>>, vector<1x1xf32>
    tpu.vector_store %arg14[%c0_41, %c0_42], %49 {strides = array<i32>} : memref<1x1xf32, #tpu.memory_space<vmem>>, vector<1x1xf32>,
    %c0_43 = arith.constant 0 : index
    %c0_44 = arith.constant 0 : index
    %51 = vector.load %arg13[%c0_43, %c0_44] : memref<1x1xf32, #tpu.memory_space<vmem>>, vector<1x1xf32>
    tpu.vector_store %arg13[%c0_43, %c0_44], %39 {strides = array<i32>} : memref<1x1xf32, #tpu.memory_space<vmem>>, vector<1x1xf32>,
    %52 = arith.truncf %44 : vector<8x1xf32> to vector<8x1xbf16>
    %cst_45 = arith.constant dense<0.000000e+00> : vector<1x32xf32>
    %53 = tpu.matmul %52, %4, %cst_45 {dimension_numbers = #tpu.dot_dimension_numbers<[0], [0], [1], [1], [0, 1, 1, 1], [], []>} : vector<8x1xbf16>, vector<8x32xbf16>, vector<1x32xf32> -> vector<1x32xf32>
    %c0_46 = arith.constant 0 : index
    %c0_47 = arith.constant 0 : index
    %54 = vector.load %arg15[%c0_46, %c0_47] : memref<1x128xf32, #tpu.memory_space<vmem>>, vector<1x32xf32>
    %55 = vector.broadcast %41 : vector<1x1xf32> to vector<1x32xf32>
    %56 = arith.mulf %55, %54 : vector<1x32xf32>
    %57 = arith.addf %56, %53 : vector<1x32xf32>
    %c0_48 = arith.constant 0 : index
    %c0_49 = arith.constant 0 : index
    %58 = vector.load %arg15[%c0_48, %c0_49] : memref<1x128xf32, #tpu.memory_space<vmem>>, vector<1x32xf32>
    tpu.vector_store %arg15[%c0_48, %c0_49], %57 {strides = array<i32>} : memref<1x128xf32, #tpu.memory_space<vmem>>, vector<1x32xf32>,
    %cst_50 = arith.constant dense<0.000000e+00> : vector<1x32xf32>
    %59 = tpu.matmul %52, %6, %cst_50 {dimension_numbers = #tpu.dot_dimension_numbers<[0], [0], [1], [1], [0, 1, 1, 1], [], []>} : vector<8x1xbf16>, vector<8x32xbf16>, vector<1x32xf32> -> vector<1x32xf32>
    %c0_51 = arith.constant 0 : index
    %c32 = arith.constant 32 : index
    %60 = vector.load %arg15[%c0_51, %c32] : memref<1x128xf32, #tpu.memory_space<vmem>>, vector<1x32xf32>
    %61 = vector.broadcast %41 : vector<1x1xf32> to vector<1x32xf32>
    %62 = arith.mulf %61, %60 : vector<1x32xf32>
    %63 = arith.addf %62, %59 : vector<1x32xf32>
    %c0_52 = arith.constant 0 : index
    %c32_53 = arith.constant 32 : index
    %64 = vector.load %arg15[%c0_52, %c32_53] : memref<1x128xf32, #tpu.memory_space<vmem>>, vector<1x32xf32>
    tpu.vector_store %arg15[%c0_52, %c32_53], %63 {strides = array<i32>} : memref<1x128xf32, #tpu.memory_space<vmem>>, vector<1x32xf32>,
    %cst_54 = arith.constant dense<0.000000e+00> : vector<1x32xf32>
    %65 = tpu.matmul %52, %8, %cst_54 {dimension_numbers = #tpu.dot_dimension_numbers<[0], [0], [1], [1], [0, 1, 1, 1], [], []>} : vector<8x1xbf16>, vector<8x32xbf16>, vector<1x32xf32> -> vector<1x32xf32>
    %c0_55 = arith.constant 0 : index
    %c64 = arith.constant 64 : index
    %66 = vector.load %arg15[%c0_55, %c64] : memref<1x128xf32, #tpu.memory_space<vmem>>, vector<1x32xf32>
    %67 = vector.broadcast %41 : vector<1x1xf32> to vector<1x32xf32>
    %68 = arith.mulf %67, %66 : vector<1x32xf32>
    %69 = arith.addf %68, %65 : vector<1x32xf32>
    %c0_56 = arith.constant 0 : index
    %c64_57 = arith.constant 64 : index
    %70 = vector.load %arg15[%c0_56, %c64_57] : memref<1x128xf32, #tpu.memory_space<vmem>>, vector<1x32xf32>
    tpu.vector_store %arg15[%c0_56, %c64_57], %69 {strides = array<i32>} : memref<1x128xf32, #tpu.memory_space<vmem>>, vector<1x32xf32>,
    %cst_58 = arith.constant dense<0.000000e+00> : vector<1x32xf32>
    %71 = tpu.matmul %52, %10, %cst_58 {dimension_numbers = #tpu.dot_dimension_numbers<[0], [0], [1], [1], [0, 1, 1, 1], [], []>} : vector<8x1xbf16>, vector<8x32xbf16>, vector<1x32xf32> -> vector<1x32xf32>
    %c0_59 = arith.constant 0 : index
    %c96 = arith.constant 96 : index
    %72 = vector.load %arg15[%c0_59, %c96] : memref<1x128xf32, #tpu.memory_space<vmem>>, vector<1x32xf32>
    %73 = vector.broadcast %41 : vector<1x1xf32> to vector<1x32xf32>
    %74 = arith.mulf %73, %72 : vector<1x32xf32>
    %75 = arith.addf %74, %71 : vector<1x32xf32>
    %c0_60 = arith.constant 0 : index
    %c96_61 = arith.constant 96 : index
    %76 = vector.load %arg15[%c0_60, %c96_61] : memref<1x128xf32, #tpu.memory_space<vmem>>, vector<1x32xf32>
    tpu.vector_store %arg15[%c0_60, %c96_61], %75 {strides = array<i32>} : memref<1x128xf32, #tpu.memory_space<vmem>>, vector<1x32xf32>,
    %c0_i32_62 = arith.constant 0 : i32
    %77 = arith.cmpi eq, %arg1, %c0_i32_62 : i32
    %78 = arith.extui %77 : i1 to i32
    %c0_i32_63 = arith.constant 0 : i32
    %79 = arith.cmpi ne, %78, %c0_i32_63 : i32
    scf.if %79 {
      %c0_64 = arith.constant 0 : index
      %c0_65 = arith.constant 0 : index
      %80 = vector.load %arg14[%c0_64, %c0_65] : memref<1x1xf32, #tpu.memory_space<vmem>>, vector<1x1xf32>
      %81 = tpu.reciprocal %80 : vector<1x1xf32> -> vector<1x1xf32>
      %c0_66 = arith.constant 0 : index
      %c0_67 = arith.constant 0 : index
      %82 = vector.load %arg15[%c0_66, %c0_67] : memref<1x128xf32, #tpu.memory_space<vmem>>, vector<1x128xf32>
      %83 = vector.broadcast %81 : vector<1x1xf32> to vector<1x128xf32>
      %84 = arith.mulf %82, %83 : vector<1x128xf32>
      %c0_68 = arith.constant 0 : index
      %c0_69 = arith.constant 0 : index
      %85 = vector.load %arg10[%c0_68, %c0_69] : memref<256x128xf32, #tpu.memory_space<vmem>>, vector<128x128xf32>
      %cst_70 = arith.constant dense<0.000000e+00> : vector<1x128xf32>
      %86 = tpu.matmul %84, %85, %cst_70 {dimension_numbers = #tpu.dot_dimension_numbers<[1], [0], [0], [1], [0, 0, 1, 1], [], []>} : vector<1x128xf32>, vector<128x128xf32>, vector<1x128xf32> -> vector<1x128xf32>
      %c0_71 = arith.constant 0 : index
      %c0_72 = arith.constant 0 : index
      %87 = vector.load %arg16[%c0_71, %c0_72] : memref<1x128xf32, #tpu.memory_space<vmem>>, vector<1x128xf32>
      %c128 = arith.constant 128 : index
      %c0_73 = arith.constant 0 : index
      %88 = vector.load %arg10[%c128, %c0_73] : memref<256x128xf32, #tpu.memory_space<vmem>>, vector<128x128xf32>
      %cst_74 = arith.constant dense<0.000000e+00> : vector<1x128xf32>
      %89 = tpu.matmul %87, %88, %cst_74 {dimension_numbers = #tpu.dot_dimension_numbers<[1], [0], [0], [1], [0, 0, 1, 1], [], []>} : vector<1x128xf32>, vector<128x128xf32>, vector<1x128xf32> -> vector<1x128xf32>
      %90 = arith.addf %86, %89 : vector<1x128xf32>
      %c0_75 = arith.constant 0 : index
      %c0_76 = arith.constant 0 : index
      %91 = vector.load %arg11[%c0_75, %c0_76] : memref<1x128xf32, #tpu.memory_space<vmem>>, vector<1x128xf32>
      %92 = arith.addf %90, %91 : vector<1x128xf32>
      %cst_77 = arith.constant dense<0xFF800000> : vector<1xf32>
      %93 = vector.multi_reduction <maximumf>, %92, %cst_77 [1] : vector<1x128xf32> to vector<1xf32>
      %94 = vector.shape_cast %93 : vector<1xf32> to vector<1x1xf32>
      %95 = vector.broadcast %94 : vector<1x1xf32> to vector<1x128xf32>
      %96 = arith.subf %92, %95 : vector<1x128xf32>
      %97 = math.exp %96 : vector<1x128xf32>
      %cst_78 = arith.constant dense<0.000000e+00> : vector<1xf32>
      %98 = vector.multi_reduction <add>, %97, %cst_78 [1] : vector<1x128xf32> to vector<1xf32>
      %99 = vector.shape_cast %98 : vector<1xf32> to vector<1x1xf32>
      %100 = tpu.reciprocal %99 : vector<1x1xf32> -> vector<1x1xf32>
      %101 = vector.broadcast %100 : vector<1x1xf32> to vector<1x128xf32>
      %102 = arith.mulf %97, %101 : vector<1x128xf32>
      %c0_79 = arith.constant 0 : index
      %c0_80 = arith.constant 0 : index
      %c0_81 = arith.constant 0 : index
      %103 = vector.load %arg12[%c0_79, %c0_80, %c0_81] : memref<1x1x128xf32, #tpu.memory_space<vmem>>, vector<1x1x128xf32>
      %104 = vector.shape_cast %103 : vector<1x1x128xf32> to vector<1x128xf32>
      %105 = vector.shape_cast %102 : vector<1x128xf32> to vector<1x1x128xf32>
      tpu.vector_store %arg12[%c0_79, %c0_80, %c0_81], %105 {strides = array<i32>} : memref<1x1x128xf32, #tpu.memory_space<vmem>>, vector<1x1x128xf32>,
    } else {
    }
    return
  }
  func.func @transform_0(%arg0: i32, %arg1: i32) -> (i32, i32, i32, i32) {
    %c4_i32 = arith.constant 4 : i32
    %c0_i32 = arith.constant 0 : i32
    %c0_i32_0 = arith.constant 0 : i32
    return %c4_i32, %arg0, %arg1, %c0_i32 : i32, i32, i32, i32
  }
  func.func @transform_1(%arg0: i32, %arg1: i32) -> (i32, i32, i32, i32) {
    %c3_i32 = arith.constant 3 : i32
    %c0_i32 = arith.constant 0 : i32
    %c0_i32_0 = arith.constant 0 : i32
    return %c3_i32, %arg0, %arg1, %c0_i32 : i32, i32, i32, i32
  }
  func.func @transform_2(%arg0: i32, %arg1: i32) -> (i32, i32, i32, i32) {
    %c2_i32 = arith.constant 2 : i32
    %c0_i32 = arith.constant 0 : i32
    %c0_i32_0 = arith.constant 0 : i32
    return %c2_i32, %arg0, %arg1, %c0_i32 : i32, i32, i32, i32
  }
  func.func @transform_3(%arg0: i32, %arg1: i32) -> (i32, i32, i32, i32) {
    %c1_i32 = arith.constant 1 : i32
    %c0_i32 = arith.constant 0 : i32
    %c0_i32_0 = arith.constant 0 : i32
    return %c1_i32, %arg0, %arg1, %c0_i32 : i32, i32, i32, i32
  }
  func.func @transform_4(%arg0: i32, %arg1: i32) -> (i32, i32, i32) {
    %c0_i32 = arith.constant 0 : i32
    %c0_i32_0 = arith.constant 0 : i32
    %c0_i32_1 = arith.constant 0 : i32
    %c0_i32_2 = arith.constant 0 : i32
    return %c0_i32, %c0_i32_0, %c0_i32_1 : i32, i32, i32
  }
  func.func @transform_5(%arg0: i32, %arg1: i32) -> (i32, i32) {
    %c0_i32 = arith.constant 0 : i32
    %c0_i32_0 = arith.constant 0 : i32
    %c0_i32_1 = arith.constant 0 : i32
    return %c0_i32, %c0_i32_0 : i32, i32
  }
  func.func @transform_6(%arg0: i32, %arg1: i32) -> (i32, i32) {
    %c0_i32 = arith.constant 0 : i32
    %c0_i32_0 = arith.constant 0 : i32
    %c0_i32_1 = arith.constant 0 : i32
    return %c0_i32, %c0_i32_0 : i32, i32
  }
  func.func @transform_7(%arg0: i32, %arg1: i32) -> (i32, i32) {
    %c0_i32 = arith.constant 0 : i32
    %c0_i32_0 = arith.constant 0 : i32
    %c0_i32_1 = arith.constant 0 : i32
    return %c0_i32, %c0_i32_0 : i32, i32
  }
  func.func @transform_8(%arg0: i32, %arg1: i32) -> (i32, i32) {
    %c0_i32 = arith.constant 0 : i32
    %c0_i32_0 = arith.constant 0 : i32
    %c0_i32_1 = arith.constant 0 : i32
    return %c0_i32, %c0_i32_0 : i32, i32
  }
  func.func @transform_9(%arg0: i32, %arg1: i32) -> (i32, i32) {
    %c0_i32 = arith.constant 0 : i32
    %c0_i32_0 = arith.constant 0 : i32
    %c0_i32_1 = arith.constant 0 : i32
    return %c0_i32, %c0_i32_0 : i32, i32
  }
  func.func @transform_10(%arg0: i32, %arg1: i32) -> (i32, i32, i32) {
    %c0_i32 = arith.constant 0 : i32
    %c0_i32_0 = arith.constant 0 : i32
    %c0_i32_1 = arith.constant 0 : i32
    return %arg0, %c0_i32, %c0_i32_0 : i32, i32, i32
  }
}

</mosaic_0001>

<bundles_post_ra>
// kernel: tpu_custom_call.1
= control target key start
LH: loop header
LB: loop body
LE: loop exit
PB: predicated region body
PF: predicated region fallthrough
CT: control target
= control target key end

     0   :  { %s2705_s0 = inlined_call_operand.hbm [shape: bf16[5,2,8,32], index: 0, kind: input, shape index: {}]   ;;  %s2706_s1 = inlined_call_operand.hbm [shape: bf16[5,2,8,32], index: 1, kind: input, shape index: {}]   ;;  %s2707_s2 = inlined_call_operand.hbm [shape: bf16[5,2,8,32], index: 2, kind: input, shape index: {}]   ;;  %s2708_s3 = inlined_call_operand.hbm [shape: bf16[5,2,8,32], index: 3, kind: input, shape index: {}]   ;;  %s2709_s4 = inlined_call_operand.hbm [shape: bf16[4,32,32], index: 4, kind: input, shape index: {}]   ;;  %s2710_s5 = inlined_call_operand.vmem [shape: f32[1,32], index: 5, kind: input, shape index: {}]   ;;  %s2711_s6 = inlined_call_operand.vmem [shape: bf16[32,1], index: 6, kind: input, shape index: {}]   ;;  %s2712_s7 = inlined_call_operand.<no memory space> [shape: f32[1,1], index: 7, kind: input, shape index: {}]   ;;  %s2713_s8 = inlined_call_operand.hbm [shape: f32[256,128], index: 8, kind: input, shape index: {}]   ;;  %s2714_s9 = inlined_call_operand.vmem [shape: f32[1,128], index: 9, kind: input, shape index: {}]   ;;  %s2715_s10 = inlined_call_operand.hbm [shape: f32[2,1,128], index: 10, kind: output, shape index: {}]  }
   0x1   :  { %2731 = sst [smem:[#allocation32_spill]] %s2706_s1  ;;  %v15_v0 = vstv %s2712_s7 }
   0x2   :  { %2732 = sst [smem:[#allocation33_spill]] %s2709_s4  ;;  %16 = vst [vmem:[#allocation6] sm:$0x1] %v15_v0 }
   0x3   :  { %2733 = sst [smem:[#allocation34_spill]] %s2710_s5 }
   0x4   :  { %2734 = sst [smem:[#allocation35_spill]] %s2714_s9 }
   0x5   :  { %2735 = sst [smem:[#allocation36_spill]] %s2715_s10 }
   0x6   :  { %17 = vsyncpa [#allocation8], 0 }
   0x7   :  { %19 = vsyncpa [#allocation8 + $0x1], 0 }
   0x8   :  { %20 = vsyncpa [#allocation11], 0 }
   0x9   :  { %22 = vsyncpa [#allocation11 + $0x1], 0 }
   0xa   :  { %23 = vsyncpa [#allocation14], 0 }
   0xb   :  { %25 = vsyncpa [#allocation14 + $0x1], 0 }
   0xc   :  { %26 = vsyncpa [#allocation17], 0 }
   0xd   :  { %27 = vsyncpa [#allocation9], 0 }
   0xe   :  { %29 = vsyncpa [#allocation9 + $0x1], 0  ;;  %s2305_s15 = smov 0   ;;  %s2307_s16 = smov 0  }
   0xf   :  { %s2309_s17 = smov 0   ;;  %s2311_s18 = smov 0  }
  0x10   :  { %s2313_s19 = smov 0   ;;  %s2315_s7 = smov 0  }
  0x11 LB: > { %2736 = sst [smem:[#allocation25_spill]] %s2206_s15  ;;  %s2336_s20 = sadd.s32 4294967295, %s2226_s7   ;;  %s2226_s7 = sphi %s2315_s7, %s35_s7   ;;  %s2222_s19 = sphi %s2313_s19, %s2776_s19   ;;  %s2218_s18 = sphi %s2311_s18, %s2775_s18   ;;  %s2214_s17 = sphi %s2309_s17, %s2779_s17   ;;  %s2210_s16 = sphi %s2307_s16, %s2778_s16   ;;  %s2206_s15 = sphi %s2305_s15, %s2777_s15  }
  0x12   : > { %2737 = sst [smem:[#allocation26_spill]] %s2218_s18  ;;  %s1593_s21 = sadd.s32 4294967294, %s2226_s7  }
  0x13   : > { %2738 = sst [smem:[#allocation27_spill]] %s2222_s19  ;;  %p69_p0 = scmp.ne.s32.totalorder %s2210_s16, %s2206_s15 }
  0x14   : > { %p2722_p1 = scmp.eq.s32.totalorder %s2336_s20, 0  ;;  %p309_p3 = scmp.eq.s32.totalorder %s1593_s21, 1 }
  0x15   : > { %p1594_p5 = scmp.ge.s32.totalorder %s2226_s7, 1  ;;  %p316_p7 = scmp.lt.s32.totalorder %s2226_s7, 3 }
  0x16   : > { %p2345_p4 = por %p2722_p1, %p69_p0  ;;  %p2350_p6 = por %p309_p3, %p69_p0 }
  0x17   : > { %p2355_p8 = pnand %p1594_p5, %p316_p7  ;;  %s2228_s25 = smov [#allocation15]  }
  0x18   : > { %s2739_s22 = scalar_select %p2345_p4, 1, 0 }
  0x19   : > { %s2740_s23 = scalar_select %p2350_p6, 1, 0 }
  0x1a   : > { %s2742_s24 = scalar_select %p2355_p8, 1, 0 }
  0x1b   : > { %2741 = sst [smem:[#allocation28_spill]] %s2740_s23  ;;  %s328_s26 = sshll.u32 %s2228_s25, 4  ;;  %s329_s26 = int_to_ptr.vmem [resolvable:$true] %s328_s26 }
  0x1c   : > { %p1846_p9 = pneg %p2355_p8  ;;  %s47_s28 = sadd.s32 1, %s2222_s19 }
  0x1d   : > { %s1973_s29 = scalar_lea.vmem %s329_s26, 1024  ;;  %p1981_p5 = scmp.lt.s32.totalorder %s329_s26, %s329_s26 }
  0x1e   : > { %p2364_p11 = pnand %p1846_p9, %p2722_p1  ;;  %p1974_p13 = scmp.ne.s32.totalorder %s329_s26, %s1973_s29 }
  0x1f   : > { %p1982_p7 = scmp.lt.s32.totalorder %s1973_s29, %s1973_s29 }
  0x20   : > { %p2723_p12 = pneg %p2364_p11 }
  0x21   : > { %p1983_p2 = por %p1982_p7, %p1981_p5 }
  0x22   : > { %p1976_p0 = pnand %p1974_p13, %p2723_p12 }
  0x24   : > { %p1977_p3 = pneg %p1976_p0 }
  0x26   : > { %p1984_p10 = pnand %p1983_p2, %p1977_p3 }
  0x28   : > { %1987 = shalt.err (!%p1984_p10)
}
  0x29   : > { %s2229_s30 = smov 64   ;;  %s2230_s11 = smov 4  }
  0x2a   : > { %s2744_s4 = sld [smem:[#allocation33_spill]]  ;;  %p49_p2 = scmp.ge.s32.totalorder %s47_s28, 2 }
  0x2b   : > { %s56_s14 = sadd.s32 1, %s2214_s17  ;;  %p63_p9 = scmp.ne.s32.totalorder %s2214_s17, %s2210_s16 }
  0x2c   : > { %p64_p10 = scmp.eq.s32.totalorder %s2226_s7, 0  ;;  %s2781_s28 = smov (%p49_p2, %s47_s28), 0 }
  0x2d   : > { %2745 = sst [smem:[#allocation29_spill]] %s2781_s28  ;;  %p2746_p0 = scmp.eq.s32.totalorder %s2336_s20, 1 }
  0x2e   : > { %p65_p13 = por %p64_p10, %p63_p9  ;;  %s51_s25 = ssub.s32 %s2222_s19, %s2781_s28 }
  0x2f   : > { %p2387_p3 = por %p2746_p0, %p63_p9  ;;  %p1872_p5 = scmp.lt.s32.totalorder %s2226_s7, 2 }
  0x30   : > { %1849 = dma.hbm_to_vmem [thread:$0]  (!%p2364_p11), %s2744_s4, 1024, %s329_s26, [#allocation14], %s2229_s30, %s2229_s30, %s2230_s11  }
  0x31   : > { %s2747_s21 = scalar_select %p2387_p3, 1, 0 }
  0x32   : > { %p54_p7 = scmp.eq.s32.totalorder %s51_s25, 0  ;;  %s2718_s29 = sand.u32 1, %s2214_s17  }
  0x33   : > { %2748 = sst [smem:[#allocation30_spill]] %s2747_s21  ;;  %s2397_s26 = sshll.u32 %s2718_s29, 2 }
  0x34   : > { %s2400_s30 = sshll.u32 %s2222_s19, 6  ;;  %p2405_p2 = pnand %p1872_p5, %p65_p13 }
  0x35   : > { %s2403_s11 = scalar_select %p54_p7, %s2214_s17, %s56_s14  }
  0x36   : > { %s2728_s13 = sand.u32 1, %s2226_s7   ;;  %s2751_s1 = sld [smem:[#allocation32_spill]] }
  0x37   : > { %2749 = sst [smem:[#allocation31_spill]] %s2403_s11  ;;  %s391_s29 = scalar_lea.vmem [#allocation10], %s2397_s26 }
  0x38   : > { %s400_s15 = sshll.u32 %s391_s29, 4  ;;  %s2417_s19 = scalar_lea.sflag [#allocation11], %s2728_s13  ;;  %s401_s15 = int_to_ptr.vmem [resolvable:$true] %s400_s15 }
  0x39   : > { %p2724_p9 = pneg %p2405_p2  ;;  %s2001_s14 = scalar_lea.vmem %s401_s15, 64 }
  0x3a   : > { %p2002_p10 = scmp.ne.s32.totalorder %s401_s15, %s2001_s14  ;;  %s2231_s11 = smov [#allocation10]  }
  0x3b   : > { %s2006_s10 = sshll.u32 %s2231_s11, 4  ;;  %s2007_s10 = int_to_ptr.vmem [resolvable:$false] %s2006_s10 }
  0x3c   : > { %s1467_s25 = scalar_lea.hbm %s2751_s1, %s2400_s30  ;;  %p2004_p13 = pnand %p2002_p10, %p2724_p9 }
  0x3d   : > { %s1468_s23 = scalar_lea.hbm %s1467_s25, 384  ;;  %s2008_s4 = scalar_lea.vmem %s2007_s10, 128 }
  0x3e   : > { %p2005_p0 = pneg %p2004_p13  ;;  %p2009_p5 = scmp.lt.s32.totalorder %s401_s15, %s2007_s10 }
  0x3f   : > { %p2010_p7 = scmp.lt.s32.totalorder %s2008_s4, %s2001_s14 }
  0x41   : > { %p2011_p1 = por %p2010_p7, %p2009_p5 }
  0x43   : > { %p2012_p12 = pnand %p2011_p1, %p2005_p0 }
  0x45   : > { %2015 = shalt.err (!%p2012_p12)
}
  0x46   : > { %1859 = dma.hbm_to_vmem [thread:$0]  (!%p2405_p2), %s1468_s23, 64, %s401_s15, %s2417_s19  }
  0x47   : > { %s2232_s28 = smov [#allocation16]   ;;  %p2752_p13 = pneg %p2364_p11 }
  0x48   : > { %s350_s29 = sshll.u32 %s2232_s28, 4  ;;  %s351_s29 = int_to_ptr.vmem [resolvable:$true] %s350_s29 }
  0x49   : > { %s2028_s25 = scalar_lea.vmem %s351_s29, 4096  ;;  %p2036_p3 = scmp.lt.s32.totalorder %s351_s29, %s351_s29 }
  0x4a   : > { %p2029_p10 = scmp.ne.s32.totalorder %s351_s29, %s2028_s25  ;;  %p2037_p4 = scmp.lt.s32.totalorder %s2028_s25, %s2028_s25 }
  0x4c   : > { %p2031_p9 = pnand %p2029_p10, %p2752_p13  ;;  %p2038_p8 = por %p2037_p4, %p2036_p3 }
  0x4e   : > { %p2032_p6 = pneg %p2031_p9 }
  0x50   : > { %p2039_p5 = pnand %p2038_p8, %p2032_p6 }
  0x52   : > { %2042 = shalt.err (!%p2039_p5)
}
  0x53   : > { %s2233_s10 = smov 128   ;;  %s2234_s15 = smov 8  }
  0x54   : > { %1852 = dma.hbm_to_vmem [thread:$0]  (!%p2364_p11), %s2713_s8, 4096, %s351_s29, [#allocation17], %s2233_s10, %s2233_s10, %s2234_s15  }
  0x55   : > { %s1460_s28 = scalar_lea.hbm %s2705_s0, %s2400_s30  ;;  %s371_s13 = scalar_lea.vmem [#allocation7], %s2397_s26 }
  0x56   : > { %s1461_s25 = scalar_lea.hbm %s1460_s28, 512  ;;  %s380_s1 = sshll.u32 %s371_s13, 4  ;;  %s381_s1 = int_to_ptr.vmem [resolvable:$true] %s380_s1 }
  0x57   : > { %s2753_s21 = sand.u32 1, %s2214_s17   ;;  %s2056_s9 = scalar_lea.vmem %s381_s1, 64 }
  0x58   : > { %s368_s18 = scalar_lea.sflag [#allocation8], %s2753_s21  ;;  %p2057_p1 = scmp.ne.s32.totalorder %s381_s1, %s2056_s9 }
  0x59   : > { %p2754_p4 = pneg %p2405_p2  ;;  %s2235_s27 = smov [#allocation7]  }
  0x5a   : > { %s2061_s5 = sshll.u32 %s2235_s27, 4  ;;  %s2062_s5 = int_to_ptr.vmem [resolvable:$false] %s2061_s5 }
  0x5b   : > { %p2059_p6 = pnand %p2057_p1, %p2754_p4  ;;  %s2063_s29 = scalar_lea.vmem %s2062_s5, 128 }
  0x5c   : > { %p2064_p11 = scmp.lt.s32.totalorder %s381_s1, %s2062_s5  ;;  %p2065_p12 = scmp.lt.s32.totalorder %s2063_s29, %s2056_s9 }
  0x5d   : > { %p2060_p8 = pneg %p2059_p6 }
  0x5e   : > { %p2066_p3 = por %p2065_p12, %p2064_p11 }
  0x60   : > { %p2067_p9 = pnand %p2066_p3, %p2060_p8 }
  0x62   : > { %2070 = shalt.err (!%p2067_p9)
}
  0x63   : > { %1856 = dma.hbm_to_vmem [thread:$0]  (!%p2405_p2), %s1461_s25, 64, %s381_s1, %s368_s18  }
  0x64   : > { %s1474_s10 = scalar_lea.hbm %s2707_s2, %s2400_s30  ;;  %s411_s15 = scalar_lea.vmem [#allocation12], %s2397_s26 }
  0x65   : > { %s420_s23 = sshll.u32 %s411_s15, 4  ;;  %s1475_s11 = scalar_lea.hbm %s1474_s10, 256  ;;  %s421_s23 = int_to_ptr.vmem [resolvable:$true] %s420_s23 }
  0x66   : > { %s2085_s14 = scalar_lea.vmem %s421_s23, 64  ;;  %p2755_p7 = pmov %p2754_p4 }
  0x67   : > { %p2086_p0 = scmp.ne.s32.totalorder %s421_s23, %s2085_s14  ;;  %s2236_s5 = smov [#allocation12]  }
  0x68   : > { %s2090_s9 = sshll.u32 %s2236_s5, 4  ;;  %s2091_s9 = int_to_ptr.vmem [resolvable:$false] %s2090_s9 }
  0x69   : > { %p2088_p10 = pnand %p2086_p0, %p2755_p7  ;;  %s2092_s4 = scalar_lea.vmem %s2091_s9, 128 }
  0x6a   : > { %p2093_p5 = scmp.lt.s32.totalorder %s421_s23, %s2091_s9  ;;  %p2094_p1 = scmp.lt.s32.totalorder %s2092_s4, %s2085_s14 }
  0x6b   : > { %p2089_p13 = pneg %p2088_p10 }
  0x6c   : > { %p2095_p4 = por %p2094_p1, %p2093_p5 }
  0x6e   : > { %p2096_p6 = pnand %p2095_p4, %p2089_p13 }
  0x70   : > { %2099 = shalt.err (!%p2096_p6)
}
  0x71   : > { %1862 = dma.hbm_to_vmem [thread:$0]  (!%p2405_p2), %s1475_s11, 64, %s421_s23, %s2417_s19  }
  0x72   : > { %s1481_s28 = scalar_lea.hbm %s2708_s3, %s2400_s30  ;;  %s431_s27 = scalar_lea.vmem [#allocation13], %s2397_s26 }
  0x73   : > { %s1482_s25 = scalar_lea.hbm %s1481_s28, 128  ;;  %s440_s29 = sshll.u32 %s431_s27, 4  ;;  %s441_s29 = int_to_ptr.vmem [resolvable:$true] %s440_s29 }
  0x74   : > { %s2756_s21 = sand.u32 1, %s2226_s7   ;;  %s2114_s10 = scalar_lea.vmem %s441_s29, 64 }
  0x75   : > { %s428_s13 = scalar_lea.sflag [#allocation14], %s2756_s21  ;;  %p2115_p8 = scmp.ne.s32.totalorder %s441_s29, %s2114_s10 }
  0x76   : > { %p2757_p11 = pmov %p2755_p7  ;;  %s2237_s15 = smov [#allocation13]  }
  0x77   : > { %s2119_s14 = sshll.u32 %s2237_s15, 4  ;;  %s2120_s14 = int_to_ptr.vmem [resolvable:$false] %s2119_s14 }
  0x78   : > { %p2117_p12 = pnand %p2115_p8, %p2757_p11  ;;  %s2121_s19 = scalar_lea.vmem %s2120_s14, 128 }
  0x79   : > { %p2122_p9 = scmp.lt.s32.totalorder %s441_s29, %s2120_s14  ;;  %p2123_p0 = scmp.lt.s32.totalorder %s2121_s19, %s2114_s10 }
  0x7a   : > { %p2118_p3 = pneg %p2117_p12 }
  0x7b   : > { %p2124_p7 = por %p2123_p0, %p2122_p9 }
  0x7d   : > { %p2125_p10 = pnand %p2124_p7, %p2118_p3 }
  0x7f   : > { %2128 = shalt.err (!%p2125_p10)
}
  0x80   : > { %1865 = dma.hbm_to_vmem [thread:$0]  (!%p2405_p2), %s1482_s25, 64, %s441_s29, %s428_s13  }
  0x81   : > { %p2758_p13 = scmp.ne.s32.totalorder %s2742_s24, 0 }
  0x82   : > { %s2473_s26 = sand.u32 (!%p2758_p13), 1, %s2210_s16   ;;  %p2759_p5 = scmp.ne.s32.totalorder (!%p2758_p13), %s2739_s22, 0 }
  0x83   : > { %449 = sbr.rel (%p2758_p13) target bundleno = 1584 (0x630), region = 60  ;;  %s2476_s30 = sshll.u32 (!%p2758_p13), %s2473_s26, 2 }
  0x84   : > { %s452_s23 = scalar_lea.sflag (!%p2758_p13), [#allocation8], %s2473_s26  ;;  %s455_s11 = scalar_lea.vmem (!%p2758_p13), [#allocation7], %s2476_s30 }
  0x88   : > { %2181 = dma.done.wait (%p2759_p5), %s452_s23, 64  }
  0x89   : > { %2183 = vsyncadd (%p2759_p5), %s452_s23, 4294967232  ;;  %s460_s24 = sand.u32 1, %s2336_s20   ;;  %s464_s5 = scalar_lea.vmem [#allocation10], %s2476_s30 }
  0x8a   : > { %s461_s12 = scalar_lea.sflag [#allocation11], %s460_s24 }
  0x8b   : > { %2185 = dma.done.wait (%p2759_p5), %s461_s12, 128  }
  0x8c   : > { %2187 = vsyncadd (%p2759_p5), %s461_s12, 4294967168  ;;  %s473_s9 = scalar_lea.vmem [#allocation12], %s2476_s30  ;;  %s479_s4 = scalar_lea.sflag [#allocation14], %s460_s24 }
  0x8d   : > { %s482_s1 = scalar_lea.vmem [#allocation13], %s2476_s30 }
  0x8e   : > { %2189 = dma.done.wait (%p2759_p5), %s479_s4, 64  }
  0x8f   : > { %2191 = vsyncadd (%p2759_p5), %s479_s4, 4294967232  ;;  %p2760_p2 = scmp.eq.s32.totalorder %s2336_s20, 0 }
  0x91   : > { %2193 = dma.done.wait (%p2760_p2), [#allocation14], 1024   ;;  %p2761_p1 = pmov %p2760_p2 }
  0x93   : > { %2195 = vsyncadd (%p2761_p1), [#allocation14], 4294966272  ;;  %p2762_p4 = pmov %p2761_p1 }
  0x94   : > { %p2763_p6 = pmov %p2761_p1 }
  0x95   : > { %2197 = dma.done.wait (%p2762_p4), [#allocation17], 4096  }
  0x96   : > { %2199 = vsyncadd (%p2763_p6), [#allocation17], 4294963200  ;;  %v2238_v1 = vmov 0.0   ;;  %vm2239_vm0 = vmmov 0   ;;  %v1940_v2 = vld [vmem:[#allocation15 + $0x18] sm:$0xff]   ;;  %v1941_v3 = vld [vmem:[#allocation15 + $0x8] sm:$0xff]   ;;  %v914_v51 = vlaneseq }
  0x97   : > { %1694 = vmatprep.subr.bf16.mxu0 %v2238_v1  ;;  %549 = vst [vmem:[#allocation4] sm:$0x1] %v2238_v1  ;;  %1702 = vmatprep.subr.bf16.mxu1 %v2238_v1  ;;  %v1942_v4 = vld [vmem:[#allocation15 + $0x10] sm:$0xff]   ;;  %v1943_v5 = vld [vmem:[#allocation15] sm:$0xff]   ;;  %v2515_v6 = vld [vmem:[%s464_s5] sm:$0xf] }
  0x98   : > { %1698 = vmatprep.mubr.msk.bf16.mxu0 %vm2239_vm0, %v2238_v1  ;;  %1706 = vmatprep.mubr.msk.bf16.mxu1 %vm2239_vm0, %v2238_v1  ;;  %v2519_v7 = vld [vmem:[%s455_s11] sm:$0xf]  ;;  %vm603_vm1 = vcmask 261120   ;;  %v1944_v8 = vld [vmem:[#allocation15 + $0x28] sm:$0xff]   ;;  %v1945_v9 = vld [vmem:[#allocation15 + $0x38] sm:$0xff]   ;;  %vm546_vm2 = vcmask 0  }
  0x99   : > { %1695 = vmatpush3.bf16.msra.mxu0 %v1940_v2  ;;  %1703 = vmatpush3.bf16.msra.mxu1 %v1941_v3  ;;  %v1946_v10 = vld [vmem:[#allocation15 + $0x20] sm:$0xff]   ;;  %v1947_v11 = vld [vmem:[#allocation15 + $0x30] sm:$0xff]   ;;  %v2539_v13 = vld [vmem:[%s482_s1] sm:$0xf]  ;;  %v2240_v16 = vmov -1e+30  }
  0x9a   : > { %1696 = vmatprep.subr.bf16.mxu0 %v2238_v1  ;;  %1704 = vmatprep.subr.bf16.mxu1 %v2238_v1  ;;  %v2535_v12 = vld [vmem:[%s473_s9] sm:$0xf]  ;;  %v1948_v14 = vld [vmem:[%s2711_s6 + $0x8] sm:$0xff]   ;;  %v1949_v15 = vld [vmem:[%s2711_s6] sm:$0xff]   ;;  %547 = vst.msk [vmem:[#allocation2] sm:$0x1] %vm546_vm2, %v2240_v16 }
  0x9b   : > { %548 = vst.msk [vmem:[#allocation3] sm:$0x1] %vm546_vm2, %v2238_v1  ;;  %s2764_s29 = sld [smem:[#allocation34_spill]]  ;;  %v2241_v40 = vmov 0   ;;  %vm956_vm3 = vcmask 1043456   ;;  %vm901_vm4 = vcmask 7168  }
  0x9c   : > { %1939 = vset.pattern.permute.xlu1 %v2241_v40  ;;  %v1013_v41 = vsel %vm956_vm3, %v2515_v6, 0  ;;  %v957_v42 = vsel %vm956_vm3, %v2519_v7, 0  ;;  %v1626_v43 = vld [vmem:[#allocation6] ss:$0 sm:$0xff]  ;;  %v2575_v55 = vshrl.u32 %v914_v51, 7  ;;  %vm952_vm5 = vcmask 64512  }
  0x9d   : > { %1697 = vmatpush3.bf16.msra.mxu0 %v1942_v4  ;;  %1705 = vmatpush3.bf16.msra.mxu1 %v1943_v5  ;;  %s2242_s21 = smov 64   ;;  %s2243_s13 = smov 96   ;;  %vm552_vm6 = vcmask 253952   ;;  %v1235_v51 = vld [vmem:[#allocation16 + $0x58] sm:$0xff]  ;;  %vm560_vm7 = vcmask 516352   ;;  %vm568_vm8 = vcmask 778752  }
  0x9e   : > { %1710 = vmatprep.subr.bf16.mxu0 %v2238_v1  ;;  %1718 = vmatprep.subr.bf16.mxu1 %v2238_v1  ;;  %v2578_v59 = vsub.s32 0, %v2575_v55  ;;  %s2245_s10 = smov 32   ;;  %vm576_vm9 = vcmask 1041152   ;;  %s2765_s19 = sld [smem:[#allocation35_spill]]  ;;  %vm1399_vm10 = vcmask 1040384  }
  0x9f   : > { %s2766_s30 = sld [smem:[#allocation26_spill]]  ;;  %s540_s24 = scalar_lea.vmem [#allocation18], %s2473_s26 }
  0xa0   : > { %1699 = vmatmul.mubr.msk.bf16.vlgmr.msra.gmra.mxu0 %vm603_vm1, %v2515_v6  ;;  %1707 = vmatmul.mubr.msk.bf16.vlgmr.msra.gmra.mxu1 %vm603_vm1, %v2519_v7  ;;  %s2767_s23 = sld [smem:[#allocation30_spill]]  ;;  %s1425_s12 = sshll.u32 %s540_s24, 4  ;;  %s1426_s12 = int_to_ptr.vmem [resolvable:$true] %s1425_s12 }
  0xa1   : > { %1711 = vmatpush3.bf16.msra.mxu0 %v1944_v8  ;;  %1719 = vmatpush3.bf16.msra.mxu1 %v1945_v9  ;;  %v1625_v29 = vld [vmem:[%s2764_s29] ss:$0 sm:$0xff]  ;;  %s2768_s4 = sld [smem:[#allocation36_spill]]  ;;  %s1413_s20 = scalar_lea.sflag [#allocation9], %s2473_s26 }
  0xa2   : > { %1712 = vmatprep.subr.bf16.mxu0 %v2238_v1  ;;  %1720 = vmatprep.subr.bf16.mxu1 %v2238_v1  ;;  %v900_v57 = vld [vmem:[#allocation2] sm:$0x1]  ;;  %s2130_s22 = scalar_lea.vmem %s1426_s12, 16  ;;  %s2246_s18 = smov [#allocation18]  }
  0xa3   : > { %1714 = vmatprep.mubr.msk.bf16.mxu0 %vm2239_vm0, %v2238_v1  ;;  %1722 = vmatprep.mubr.msk.bf16.mxu1 %vm2239_vm0, %v2238_v1  ;;  %p2131_p8 = scmp.ne.s32.totalorder %s1426_s12, %s2130_s22  ;;  %s2134_s28 = sshll.u32 %s2246_s18, 4  ;;  %s2135_s28 = int_to_ptr.vmem [resolvable:$false] %s2134_s28 }
  0xa4   : > { %s2136_s25 = scalar_lea.vmem %s2135_s28, 32  ;;  %p2137_p9 = scmp.lt.s32.totalorder %s1426_s12, %s2135_s28 }
  0xa5   : > { %1713 = vmatpush3.bf16.msra.mxu0 %v1946_v10  ;;  %1721 = vmatpush3.bf16.msra.mxu1 %v1947_v11  ;;  %v922_v11 = vld [vmem:[#allocation3] sm:$0x1]  ;;  %p2138_p0 = scmp.lt.s32.totalorder %s2136_s25, %s2130_s22 }
  0xa6   : > { %1726 = vmatprep.subr.bf16.mxu0 %v2238_v1  ;;  %1734 = vmatprep.subr.bf16.mxu1 %v2238_v1  ;;  %p2769_p11 = scmp.ne.s32.totalorder %s2767_s23, 0 }
  0xa7   : > { %p2139_p7 = por %p2138_p0, %p2137_p9 }
  0xa8   : > { %1715 = vmatmul.mubr.msk.bf16.vlgmr.msra.gmra.mxu0 %vm603_vm1, %v2535_v12  ;;  %1723 = vmatmul.mubr.msk.bf16.vlgmr.msra.gmra.mxu1 %vm603_vm1, %v2539_v13  ;;  %p2132_p12 = pnand %p2131_p8, %p2769_p11 }
  0xa9   : > { %1730 = vmatprep.mubr.msk.bf16.mxu0 %vm2239_vm0, %v2238_v1  ;;  %1736 = vmatprep.mubr.msk.bf16.mxu1 %vm2239_vm0, %v2238_v1 }
  0xaa   : > { %1727 = vmatpush3.bf16.msra.mxu0 %v1948_v14  ;;  %1735 = vmatpush3.bf16.msra.mxu1 %v957_v42  ;;  %p2133_p3 = pneg %p2132_p12 }
  0xab   : > { %1728 = vmatprep.subr.bf16.mxu0 %v2238_v1  ;;  %1746 = vmatprep.subr.bf16.mxu1 %v2238_v1 }
  0xac   : > { %p2140_p10 = pnand %p2139_p7, %p2133_p3 }
  0xae   : > { %1729 = vmatpush3.bf16.msra.mxu0 %v1949_v15 }
  0xaf   : > { %1740 = vmatprep.subr.bf16.mxu0 %v2238_v1 }
 0x160   : > { %v641_v17 = vpop.f32.mrf.mxu0  ;;  %v696_v18 = vpop.f32.mrf.mxu1 }
 0x161   : > { %v697_v24 = vadd.f32 %v696_v18, %v641_v17  ;;  %v1078_v18 = vsel %vm956_vm3, %v2535_v12, 0  ;;  %v562_v12 = vld [vmem:[%s473_s9] sm:$0x1] }
 0x162   : > { %v1700_v19 = vpop.f32.mrf.mxu0  ;;  %v1708_v20 = vpop.f32.mrf.mxu1 }
 0x163   : > { %v1143_v19 = vsel %vm956_vm3, %v2539_v13, 0  ;;  %v570_v13 = vld [vmem:[%s482_s1] sm:$0x1] }
 0x164   : > { %v644_v21 = vpop.f32.mrf.mxu0  ;;  %v699_v22 = vpop.f32.mrf.mxu1 }
 0x165   : > { %v563_v21 = vunpack.c.l.bf16 %v562_v12  ;;  %v571_v22 = vunpack.c.l.bf16 %v570_v13  ;;  %v1228_v13 = vld [vmem:[#allocation16 + $0x20] sm:$0xff] }
 0x166   : > { %v1701_v23 = vpop.f32.mrf.mxu0  ;;  %v1709_v25 = vpop.f32.mrf.mxu1 }
 0x167   : > { %v2244_v23 = vmov 1966171168  }
 0x168   : > { %v756_v26 = vpop.f32.mrf.mxu0  ;;  %v817_v28 = vpop.f32.mrf.mxu1 }
 0x169   : > { %v762_v27 = vadd.f32 %v756_v26, %v697_v24  ;;  %v1059_v24 = vunpack.c.l.s4 %v2244_v23  ;;  %v1243_v23 = vld [vmem:[#allocation16 + $0x90] sm:$0xff] }
 0x16a   : > { %v1716_v30 = vpop.f32.mrf.mxu0  ;;  %v1724_v32 = vpop.f32.mrf.mxu1 }
 0x16b   : > { %v823_v31 = vadd.f32 %v817_v28, %v762_v27  ;;  %v1060_v26 = vunpack.c.0.s8 %v1059_v24  ;;  %v1256_v27 = vld [vmem:[#allocation16 + $0xf8] sm:$0xff]  ;;  %v1226_v24 = vld [vmem:[#allocation16 + $0x10] sm:$0xff] }
 0x16c   : > { %v759_v33 = vpop.f32.mrf.mxu0  ;;  %v820_v35 = vpop.f32.mrf.mxu1  ;;  %v1239_v28 = vld [vmem:[#allocation16 + $0x78] sm:$0xff] }
 0x16d   : > { %v831_v34 = vadd.f32 %v1625_v29, %v823_v31  ;;  %v1255_v29 = vld [vmem:[#allocation16 + $0xf0] sm:$0xff]  ;;  %v999_v32 = vld [vmem:[#allocation4] sm:$0x1]  ;;  %v2610_v33 = vsub.s32 %v1060_v26, %v2575_v55  ;;  %v1254_v35 = vld [vmem:[#allocation16 + $0xe8] sm:$0xff] }
 0x16e   : > { %v1717_v36 = vpop.f32.mrf.mxu0  ;;  %v1725_v37 = vpop.f32.mrf.mxu1  ;;  %v1238_v31 = vld [vmem:[#allocation16 + $0x70] sm:$0xff]  ;;  %v1242_v26 = vld [vmem:[#allocation16 + $0x88] sm:$0xff] }
 0x16f   : > { %1950 = vtanh.f32 %v831_v34  ;;  %v1234_v55 = vld [vmem:[#allocation16 + $0x50] sm:$0xff] }
 0x17c   : > { %v1951_v38 = vpop.eup %1950 }
 0x17d   : > { %v833_v39 = vpack.c.bf16 %v1951_v38, %v1951_v38 }
 0x17f   : > { %1731 = vmatmul.mubr.msk.bf16.vlgmr.msra.gmra.mxu0 %vm603_vm1, %v833_v39 }
 0x180   : > { %1742 = vmatprep.mubr.msk.bf16.mxu0 %vm2239_vm0, %v2238_v1  ;;  %1741 = vmatpush3.bf16.msra.mxu0 %v1013_v41  ;;  %v1253_v41 = vld [vmem:[#allocation16 + $0xe0] sm:$0xff] }
 0x181   : > { %1752 = vmatprep.subr.bf16.mxu0 %v2238_v1 }
 0x23f   : > { %v894_v44 = vpop.f32.mrf.mxu0 }
 0x240   : > { %v895_v45 = vadd.f32 %v1626_v43, %v894_v44 }
 0x241   : > { %v1732_v46 = vpop.f32.mrf.mxu0 }
 0x242   : > { %v902_v47 = vsel %vm901_vm4, %v895_v45, -inf  ;;  %v1252_v46 = vld [vmem:[#allocation16 + $0xd8] sm:$0xff] }
 0x243   : > { %v903_v48 = vrot.slane %v902_v47, 4  ;;  %v897_v49 = vpop.f32.mrf.mxu0 }
 0x244   : > { %v550_v49 = vld [vmem:[%s455_s11] sm:$0x1]  ;;  %s1634_s11 = sshll.u32 %s2766_s30, 4 }
 0x245   : > { %v904_v50 = vmax.f32 %v902_v47, %v903_v48  ;;  %v1733_v52 = vpop.f32.mrf.mxu0  ;;  %s1423_s1 = scalar_lea.hbm %s2768_s4, %s1634_s11 }
 0x246   : > { %v1251_v52 = vld [vmem:[#allocation16 + $0xd0] sm:$0xff] }
 0x247   : > { %v905_v53 = vrot.slane %v904_v50, 2 }
 0x249   : > { %v906_v54 = vmax.f32 %v904_v50, %v905_v53  ;;  %v551_v50 = vunpack.c.l.bf16 %v550_v49 }
 0x24b   : > { %v907_v56 = vrot.slane %v906_v54, 1  ;;  %553 = vst.msk [vmem:[#allocation5] sm:$0x1] %vm552_vm6, %v551_v50 }
 0x24d   : > { %v908_v58 = vmax.f32 %v906_v54, %v907_v56  ;;  %v1250_v56 = vld [vmem:[#allocation16 + $0xc8] sm:$0xff] }
 0x24f   : > { %v909_v60 = vmax.f32 %v900_v57, %v908_v58 }
 0x251   : > { %v917_v61 = vrot.slane %v909_v60, %v2578_v59  ;;  %934 = vst.msk [vmem:[#allocation2] sm:$0x1] %vm546_vm2, %v909_v60  ;;  %v910_v0 = vsub.f32 %v900_v57, %v909_v60 }
 0x253   : > { %v919_v62 = vsub.f32 %v895_v45, %v917_v61  ;;  %v911_v2 = vmul.f32 1.442695, %v910_v0  ;;  %v1236_v45 = vld [vmem:[#allocation16 + $0x60] sm:$0xff] }
 0x255   : > { %v920_v63 = vmul.f32 1.442695, %v919_v62  ;;  %v1233_v62 = vld [vmem:[#allocation16 + $0x48] sm:$0xff] }
 0x257   : > { %1952 = vpow2.f32 %v920_v63  ;;  %v1249_v63 = vld [vmem:[#allocation16 + $0xc0] sm:$0xff] }
 0x258   : > { %1954 = vpow2.f32 %v911_v2 }
 0x264   : > { %v1953_v3 = vpop.eup %1952 }
 0x265   : > { %v924_v4 = vsel %vm901_vm4, %v1953_v3, 0.0  ;;  %v935_v5 = vpack.c.bf16 %v1953_v3, %v1953_v3  ;;  %v1955_v10 = vpop.eup %1954  ;;  %v554_v3 = vld [vmem:[%s464_s5] sm:$0x1] }
 0x266   : > { %v925_v6 = vrot.slane %v924_v4, 4  ;;  %v923_v15 = vmul.f32 %v1955_v10, %v922_v11  ;;  %v1247_v11 = vld [vmem:[#allocation16 + $0xb0] sm:$0xff] }
 0x267   : > { %936 = vxpose.xlu0.c.b16.start.end [1/1] (short) (narrow) %v935_v5, 16  ;;  %v1232_v5 = vld [vmem:[#allocation16 + $0x40] sm:$0xff] }
 0x268   : > { %v926_v7 = vadd.f32 %v925_v6, %v924_v4  ;;  %v1248_v6 = vld [vmem:[#allocation16 + $0xb8] sm:$0xff] }
 0x26a   : > { %v927_v8 = vrot.slane %v926_v7, 2 }
 0x26c   : > { %v928_v9 = vadd.f32 %v927_v8, %v926_v7 }
 0x26e   : > { %v929_v14 = vrot.slane %v928_v9, 1 }
 0x270   : > { %v930_v16 = vadd.f32 %v929_v14, %v928_v9  ;;  %1938 = vset.pattern.permute.xlu0 %v2241_v40  ;;  %v1237_v40 = vld [vmem:[#allocation16 + $0x68] sm:$0xff]  ;;  %v555_v9 = vunpack.c.l.bf16 %v554_v3 }
 0x271   : > { %1002 = vperm.xlu0 %1938, %v1955_v10   ;;  %v1231_v10 = vld [vmem:[#allocation16 + $0x38] sm:$0xff] }
 0x272   : > { %v931_v17 = vadd.f32 %v930_v16, %v923_v15 }
 0x274   : > { %933 = vst.msk [vmem:[#allocation3] sm:$0x1] %vm546_vm2, %v931_v17  ;;  %v1230_v17 = vld [vmem:[#allocation16 + $0x30] sm:$0xff] }
 0x275   : > { %565 = vrot.lane.b32.xlu0 %v563_v21, %s2242_s21  ;;  %v1244_v21 = vld [vmem:[#allocation16 + $0x98] sm:$0xff] }
 0x279   : > { %573 = vrot.lane.b32.xlu0 %v571_v22, %s2243_s13  ;;  %v1227_v22 = vld [vmem:[#allocation16 + $0x18] sm:$0xff] }
 0x27b   : > { %v1211_v60 = vld [vmem:[#allocation3] sm:$0x1] }
 0x27c   : > { %1956 = vrcp.f32 %v1211_v60 }
 0x2c9   : > { %v944_v20 = vpop.trf.xlu0 }
 0x2ca   : > { %1737 = vmatmul.mubr.msk.bf16.vlgmr.msra.gmra.mxu1 %vm952_vm5, %v944_v20  ;;  %1743 = vmatmul.mubr.msk.bf16.vlgmr.msra.gmra.mxu0 %vm952_vm5, %v944_v20 }
 0x2cb   : > { %1747 = vmatpush3.bf16.msra.mxu1 %v1078_v18  ;;  %1753 = vmatpush3.bf16.msra.mxu0 %v1143_v19  ;;  %v1246_v18 = vld [vmem:[#allocation16 + $0xa8] sm:$0xff] }
 0x2cc   : > { %1748 = vmatprep.mubr.msk.bf16.mxu1 %vm2239_vm0, %v2238_v1  ;;  %1754 = vmatprep.mubr.msk.bf16.mxu0 %vm2239_vm0, %v2238_v1  ;;  %v1229_v19 = vld [vmem:[#allocation16 + $0x28] sm:$0xff] }
 0x2cd   : > { %1758 = vmatprep.subr.mxu1 %v2238_v1  ;;  %1793 = vmatprep.subr.mxu0 %v2238_v1 }
 0x2d2   : > { %1749 = vmatmul.mubr.msk.bf16.vlgmr.msra.gmra.mxu1 %vm952_vm5, %v944_v20  ;;  %1755 = vmatmul.mubr.msk.bf16.vlgmr.msra.gmra.mxu0 %vm952_vm5, %v944_v20  ;;  %v1245_v20 = vld [vmem:[#allocation16 + $0xa0] sm:$0xff] }
 0x2d3   : > { %1790 = vmatprep.mubr.msk.f32.mxu1 %vm2239_vm0, %v2238_v1  ;;  %1825 = vmatprep.mubr.msk.f32.mxu0 %vm2239_vm0, %v2238_v1 }
 0x2d4   : > { %1759 = vmatpush3.msra.mxu1 %v1256_v27  ;;  %1794 = vmatpush3.msra.mxu0 %v1239_v28  ;;  %v1225_v27 = vld [vmem:[#allocation16 + $0x8] sm:$0xff]  ;;  %v1241_v28 = vld [vmem:[#allocation16 + $0x80] sm:$0xff] }
 0x2d5   : > { %1760 = vmatprep.subr.mxu1 %v2238_v1  ;;  %1795 = vmatprep.subr.mxu0 %v2238_v1 }
 0x2d6   : > { %1761 = vmatpush3.msra.mxu1 %v1255_v29  ;;  %1796 = vmatpush3.msra.mxu0 %v1238_v31  ;;  %v1224_v29 = vld [vmem:[#allocation16] sm:$0xff] }
 0x2d7   : > { %1762 = vmatprep.subr.mxu1 %v2238_v1  ;;  %1797 = vmatprep.subr.mxu0 %v2238_v1 }
 0x2d8   : > { %1763 = vmatpush3.msra.mxu1 %v1254_v35  ;;  %1798 = vmatpush3.msra.mxu0 %v1237_v40 }
 0x2d9   : > { %1764 = vmatprep.subr.mxu1 %v2238_v1  ;;  %1799 = vmatprep.subr.mxu0 %v2238_v1 }
 0x2da   : > { %1765 = vmatpush3.msra.mxu1 %v1253_v41  ;;  %1800 = vmatpush3.msra.mxu0 %v1236_v45 }
 0x2db   : > { %1766 = vmatprep.subr.mxu1 %v2238_v1  ;;  %1801 = vmatprep.subr.mxu0 %v2238_v1 }
 0x2dc   : > { %1767 = vmatpush3.msra.mxu1 %v1252_v46  ;;  %1802 = vmatpush3.msra.mxu0 %v1235_v51 }
 0x2dd   : > { %1768 = vmatprep.subr.mxu1 %v2238_v1  ;;  %1803 = vmatprep.subr.mxu0 %v2238_v1 }
 0x2de   : > { %1769 = vmatpush3.msra.mxu1 %v1251_v52  ;;  %1804 = vmatpush3.msra.mxu0 %v1234_v55 }
 0x2df   : > { %1770 = vmatprep.subr.mxu1 %v2238_v1  ;;  %1805 = vmatprep.subr.mxu0 %v2238_v1 }
 0x2e0   : > { %1771 = vmatpush3.msra.mxu1 %v1250_v56  ;;  %1806 = vmatpush3.msra.mxu0 %v1233_v62 }
 0x2e1   : > { %1772 = vmatprep.subr.mxu1 %v2238_v1  ;;  %1807 = vmatprep.subr.mxu0 %v2238_v1 }
 0x2e2   : > { %1773 = vmatpush3.msra.mxu1 %v1249_v63  ;;  %1808 = vmatpush3.msra.mxu0 %v1232_v5 }
 0x2e3   : > { %1774 = vmatprep.subr.mxu1 %v2238_v1  ;;  %1809 = vmatprep.subr.mxu0 %v2238_v1 }
 0x2e4   : > { %1775 = vmatpush3.msra.mxu1 %v1248_v6  ;;  %1810 = vmatpush3.msra.mxu0 %v1231_v10 }
 0x2e5   : > { %1776 = vmatprep.subr.mxu1 %v2238_v1  ;;  %1811 = vmatprep.subr.mxu0 %v2238_v1 }
 0x2e6   : > { %1777 = vmatpush3.msra.mxu1 %v1247_v11  ;;  %1812 = vmatpush3.msra.mxu0 %v1230_v17 }
 0x2e7   : > { %1778 = vmatprep.subr.mxu1 %v2238_v1  ;;  %1813 = vmatprep.subr.mxu0 %v2238_v1 }
 0x2e8   : > { %1779 = vmatpush3.msra.mxu1 %v1246_v18  ;;  %1814 = vmatpush3.msra.mxu0 %v1229_v19 }
 0x2e9   : > { %1780 = vmatprep.subr.mxu1 %v2238_v1  ;;  %1815 = vmatprep.subr.mxu0 %v2238_v1 }
 0x2ea   : > { %1781 = vmatpush3.msra.mxu1 %v1245_v20  ;;  %1816 = vmatpush3.msra.mxu0 %v1228_v13 }
 0x2eb   : > { %1782 = vmatprep.subr.mxu1 %v2238_v1  ;;  %1817 = vmatprep.subr.mxu0 %v2238_v1 }
 0x2ec   : > { %v1003_v25 = vpop.permute.xlu0 %1002  ;;  %1783 = vmatpush3.msra.mxu1 %v1244_v21  ;;  %1818 = vmatpush3.msra.mxu0 %v1227_v22 }
 0x2ed   : > { %v2605_v30 = vrot.slane %v1003_v25, %v2578_v59  ;;  %1784 = vmatprep.subr.mxu1 %v2238_v1  ;;  %v1957_v25 = vpop.eup %1956  ;;  %1819 = vmatprep.subr.mxu0 %v2238_v1 }
 0x2ee   : > { %1785 = vmatpush3.msra.mxu1 %v1243_v23  ;;  %1820 = vmatpush3.msra.mxu0 %v1226_v24 }
 0x2ef   : > { %v1009_v34 = vmul.f32 %v2605_v30, %v999_v32  ;;  %1786 = vmatprep.subr.mxu1 %v2238_v1  ;;  %1821 = vmatprep.subr.mxu0 %v2238_v1 }
 0x2f0   : > { %1787 = vmatpush3.msra.mxu1 %v1242_v26  ;;  %1822 = vmatpush3.msra.mxu0 %v1225_v27  ;;  %v566_v35 = vpop.permute.xlu0 %565 }
 0x2f1   : > { %1788 = vmatprep.subr.mxu1 %v2238_v1  ;;  %1823 = vmatprep.subr.mxu0 %v2238_v1 }
 0x2f2   : > { %1789 = vmatpush3.msra.mxu1 %v1241_v28  ;;  %1824 = vmatpush3.msra.mxu0 %v1224_v29 }
 0x2f4   : > { %v574_v40 = vpop.permute.xlu0 %573 }
 0x38a   : > { %v993_v36 = vpop.f32.mrf.mxu1  ;;  %v1049_v37 = vpop.f32.mrf.mxu0 }
 0x38b   : > { %v1010_v38 = vadd.f32 %v1009_v34, %v993_v36  ;;  %v1064_v39 = vrot.slane %v1049_v37, %v2610_v33 }
 0x38c   : > { %v1738_v42 = vpop.f32.mrf.mxu1  ;;  %v1744_v43 = vpop.f32.mrf.mxu0 }
 0x38d   : > { %1012 = vst.msk [vmem:[#allocation4] sm:$0x1] %vm552_vm6, %v1010_v38  ;;  %v1071_v44 = vrot.slane %v1064_v39, %v2610_v33 }
 0x38e   : > { %v996_v47 = vpop.f32.mrf.mxu1  ;;  %v1052_v48 = vpop.f32.mrf.mxu0 }
 0x38f   : > { %1072 = vrot.lane.b32.xlu1 %v1071_v44, %s2245_s10 }
 0x390   : > { %v1739_v53 = vpop.f32.mrf.mxu1  ;;  %v1745_v54 = vpop.f32.mrf.mxu0 }
 0x391   : > { %v1397_v53 = vld [vmem:[%s2765_s19] sm:$0x1] }
 0x392   : > { %v1114_v57 = vpop.f32.mrf.mxu1  ;;  %v1179_v58 = vpop.f32.mrf.mxu0 }
 0x393   : > { %v1129_v61 = vrot.slane %v1114_v57, %v2610_v33  ;;  %v1194_v16 = vrot.slane %v1179_v58, %v2610_v33 }
 0x394   : > { %v1750_v0 = vpop.f32.mrf.mxu1  ;;  %v1756_v2 = vpop.f32.mrf.mxu0  ;;  %v1055_v31 = vld [vmem:[#allocation4] sm:$0x1] }
 0x395   : > { %v1136_v4 = vrot.slane %v1129_v61, %v2610_v33  ;;  %v1201_v12 = vrot.slane %v1194_v16, %v2610_v33  ;;  %v1056_v32 = vmul.f32 %v1055_v31, %v2605_v30 }
 0x396   : > { %v1117_v7 = vpop.f32.mrf.mxu1  ;;  %v1182_v8 = vpop.f32.mrf.mxu0 }
 0x397   : > { %1137 = vrot.lane.b32.xlu1 %v1136_v4, %s2242_s21 }
 0x398   : > { %v1751_v14 = vpop.f32.mrf.mxu1  ;;  %v1757_v15 = vpop.f32.mrf.mxu0 }
 0x39b   : > { %557 = vrot.lane.b32.xlu1 %v555_v9, %s2245_s10 }
 0x39f   : > { %1202 = vrot.lane.b32.xlu1 %v1201_v12, %s2243_s13 }
 0x3a3   : > { %1216 = vperm.xlu1 %1939, %v1957_v25  }
 0x401   : > { %v1073_v33 = vpop.permute.xlu1 %1072 }
 0x402   : > { %v1075_v34 = vadd.f32 %v1073_v33, %v1056_v32 }
 0x404   : > { %1077 = vst.msk [vmem:[#allocation4] sm:$0x1] %vm560_vm7, %v1075_v34 }
 0x409   : > { %v1138_v36 = vpop.permute.xlu1 %1137 }
 0x40b   : > { %v1120_v37 = vld [vmem:[#allocation4] sm:$0x1] }
 0x40c   : > { %v1121_v38 = vmul.f32 %v1120_v37, %v2605_v30 }
 0x40d   : > { %v558_v39 = vpop.permute.xlu1 %557 }
 0x40e   : > { %v1140_v41 = vadd.f32 %v1138_v36, %v1121_v38  ;;  %561 = vst.msk [vmem:[#allocation5] sm:$0x1] %vm560_vm7, %v558_v39 }
 0x40f   : > { %569 = vst.msk [vmem:[#allocation5] sm:$0x1] %vm568_vm8, %v566_v35 }
 0x410   : > { %1142 = vst.msk [vmem:[#allocation4] sm:$0x1] %vm568_vm8, %v1140_v41 }
 0x411   : > { %577 = vst.msk [vmem:[#allocation5] sm:$0x1] %vm576_vm9, %v574_v40  ;;  %v1203_v44 = vpop.permute.xlu1 %1202 }
 0x417   : > { %v1185_v1 = vld [vmem:[#allocation4] sm:$0x1] }
 0x418   : > { %v1240_v42 = vld [vmem:[#allocation5] sm:$0x1]  ;;  %v1186_v43 = vmul.f32 %v1185_v1, %v2605_v30 }
 0x419   : > { %1791 = vmatmul.mubr.f32.vlgmr.msra.gmra.mxu1 %v1240_v42 }
 0x41a   : > { %v1205_v45 = vadd.f32 %v1203_v44, %v1186_v43 }
 0x41c   : > { %1207 = vst.msk [vmem:[#allocation4] sm:$0x1] %vm576_vm9, %v1205_v45 }
 0x41e   : > { %v1217_v46 = vpop.permute.xlu1 %1216 }
 0x41f   : > { %v1222_v47 = vrot.slane %v1217_v46, %v2578_v59 }
 0x423   : > { %v1213_v48 = vld [vmem:[#allocation4] sm:$0x1] }
 0x424   : > { %v1223_v49 = vmul.f32 %v1222_v47, %v1213_v48 }
 0x426   : > { %1826 = vmatmul.mubr.f32.vlgmr.msra.gmra.mxu0 %v1223_v49 }
 0x4d9   : > { %v1323_v50 = vpop.f32.mrf.mxu1 }
 0x4db   : > { %v1792_v51 = vpop.f32.mrf.mxu1 }
 0x4e6   : > { %v1393_v52 = vpop.f32.mrf.mxu0 }
 0x4e7   : > { %v1394_v54 = vadd.f32 %v1393_v52, %v1323_v50 }
 0x4e8   : > { %v1827_v30 = vpop.f32.mrf.mxu0 }
 0x4e9   : > { %v1398_v55 = vadd.f32 %v1397_v53, %v1394_v54 }
 0x4eb   : > { %v1400_v56 = vsel %vm1399_vm10, %v1398_v55, -inf }
 0x4ec   : > { %1401 = vmax.xlane.f32.xlu1 %v1400_v56 }
 0x575   : > { %v1402_v57 = vpop.xlane.xlu1 %1401 }
 0x576   : > { %v1403_v59 = vsub.f32 %v1398_v55, %v1402_v57 }
 0x578   : > { %v1404_v58 = vmul.f32 1.442695, %v1403_v59 }
 0x57a   : > { %1958 = vpow2.f32 %v1404_v58 }
 0x587   : > { %v1959_v60 = vpop.eup %1958 }
 0x588   : > { %v1406_v61 = vsel %vm1399_vm10, %v1959_v60, 0.0 }
 0x589   : > { %1407 = vadd.xlane.f32.xlu0 %v1406_v61 }
 0x612   : > { %v1408_v62 = vpop.xlane.xlu0 %1407 }
 0x613   : > { %1960 = vrcp.f32 %v1408_v62 }
 0x620   : > { %v1961_v63 = vpop.eup %1960 }
 0x621   : > { %v1410_v0 = vmul.f32 %v1961_v63, %v1959_v60 }
 0x623   : > { %1411 = vst [vmem:[%s540_s24] sm:$0x1] %v1410_v0 }
 0x624   : > { %2143 = shalt.err (!%p2140_p10)
}
 0x625   : > { %s2144_s27 = scalar_lea.hbm %s1423_s1, 16  ;;  %s2148_s21 = scalar_lea.hbm %s2768_s4, 32 }
 0x626   : > { %p2145_p13 = scmp.ne.s32.totalorder %s1423_s1, %s2144_s27  ;;  %p2149_p1 = scmp.lt.s32.totalorder %s1423_s1, %s2768_s4 }
 0x627   : > { %p2150_p4 = scmp.lt.s32.totalorder %s2148_s21, %s2144_s27 }
 0x628   : > { %p2146_p5 = pnand %p2145_p13, %p2769_p11 }
 0x629   : > { %p2151_p6 = por %p2150_p4, %p2149_p1 }
 0x62a   : > { %p2147_p2 = pneg %p2146_p5 }
 0x62c   : > { %p2152_p8 = pnand %p2151_p6, %p2147_p2 }
 0x62e   : > { %2155 = shalt.err (!%p2152_p8)
}
 0x62f   : > { %1844 = dma.vmem_to_hbm [thread:$0]  (%p2769_p11), %s1426_s12, 16, %s1423_s1, %s1413_s20  }
 0x630 PF: > { %s2770_s15 = sld [smem:[#allocation25_spill]]  ;;  %p2773_p3 = scmp.ge.s32.totalorder %s2226_s7, 2 }
 0x631   : > { %s2771_s14 = sld [smem:[#allocation28_spill]] }
 0x636   : > { %s1437_s19 = sand.u32 1, %s2770_s15  }
 0x637   : > { %p2772_p12 = scmp.ne.s32.totalorder %s2771_s14, 0  ;;  %s1438_s30 = scalar_lea.sflag [#allocation9], %s1437_s19 }
 0x639   : > { %p1867_p9 = pnand %p2773_p3, %p2772_p12 }
 0x63b   : > { %p1868_p0 = pneg %p1867_p9 }
 0x63d   : > { %2201 = dma.done.wait (%p1868_p0), %s1438_s30, 16  }
 0x63e   : > { %2203 = vsyncadd (%p1868_p0), %s1438_s30, 4294967280  ;;  %s35_s7 = sadd.s32 1, %s2226_s7   ;;  %s2774_s11 = sld [smem:[#allocation31_spill]] }
 0x63f   : > { %p32_p7 = scmp.ge.s32.totalorder %s35_s7, 4   ;;  %s2775_s18 = sld [smem:[#allocation27_spill]] }
 0x640   : > { %s2776_s19 = sld [smem:[#allocation29_spill]]  ;;  %s2777_s15 = smov %s2210_s16 }
 0x641   : > { %s2778_s16 = smov %s2214_s17  ;;  %34 = sbr.rel (!%p32_p7) target bundleno = 17 (0x11), region = 161 }
 0x644   : > { %s2779_s17 = smov %s2774_s11 }
 0x646   :  { %1442 = vsyncpa [#allocation8], 1 }
 0x647   :  { %1444 = vsyncpa [#allocation8 + $0x1], 1 }
 0x648   :  { %1445 = vsyncpa [#allocation11], 1 }
 0x649   :  { %1447 = vsyncpa [#allocation11 + $0x1], 1 }
 0x64a   :  { %1448 = vsyncpa [#allocation14], 1 }
 0x64b   :  { %1450 = vsyncpa [#allocation14 + $0x1], 1 }
 0x64c   :  { %1451 = vsyncpa [#allocation17], 1 }
 0x64d   :  { %1452 = vsyncpa [#allocation9], 1 }
 0x64e   :  { %1454 = vsyncpa [#allocation9 + $0x1], 1 }

</bundles_post_ra>
